<compile_context>
chip_gen: v6e
topology: v6e:2x2x1
jax: 0.10.0
libtpu: 0.0.40
codegen_flags: <defaults>
</compile_context>

<pallas_src>
import jax
import jax.numpy as jnp
from jax.experimental import pallas as pl
from jax.experimental.pallas import tpu as pltpu

ALPHA = 0.2   # hparams.alpha (LeakyReLU negative slope in SPGAT)
HP = 128      # lane-padded hidden width (H=32 zero-padded to 128)


# ----------------------------- kernel helpers -------------------------------
def _eye(n, dtype=jnp.float32):
    r = jax.lax.broadcasted_iota(jnp.int32, (n, n), 0)
    c = jax.lax.broadcasted_iota(jnp.int32, (n, n), 1)
    return (r == c).astype(dtype)


def _mm(a, b):  # a @ b
    return jnp.dot(a, b, preferred_element_type=jnp.float32)


def _mm_nt(a, b):  # a @ b.T   (contract last dim of both)
    return jax.lax.dot_general(a, b, (((1,), (1,)), ((), ())),
                               preferred_element_type=jnp.float32)


# -------------------- fused GraphEncoderTL (2 core layers) -------------------
def fused_tl_kernel(sa_t_ref, fa_t_ref, sa_ref, fa_ref, struct_adj_ref,
                    adj_mask_ref, raw_feat_ref,
                    fgw_ref, fgb_ref, sgw_ref, sgb_ref, gw_ref, ga_ref,
                    out_ref):
    sa_t = sa_t_ref[...]             # [Ns, N]  raw struct_assign, pre-transposed
    fa_t = fa_t_ref[...]             # [Nf, Ns] raw fnc_assign,   pre-transposed
    SA = sa_ref[...]                 # [N,  Ns] raw struct_assign
    FA = fa_ref[...]                 # [Ns, Nf] raw fnc_assign
    struct_adj = struct_adj_ref[...] # [Ns, Ns]
    mask = adj_mask_ref[...]         # [N,  N ] 0/1 edge mask (stands in for COO indices)
    feat = raw_feat_ref[...]         # [N,  HP] lane-padded raw features

    n = feat.shape[0]
    ns = struct_adj.shape[0]
    nf = fa_t.shape[0]

    # ---------- layer-independent pre-computation (hoisted) ----------
    # column-normalized assignments expressed on the transposed copies so all
    # downstream contractions are plain last-dim matmuls.
    sa_n_t = sa_t / (jnp.maximum(jnp.sum(sa_t, axis=1, keepdims=True) - 1.0, 0.0) + 1.0)
    fa_n_t = fa_t / (jnp.maximum(jnp.sum(fa_t, axis=1, keepdims=True) - 1.0, 0.0) + 1.0)
    # denom for fnc_message = row-sums of the column-normalized fnc_assign.
    fa_colnorm = jnp.maximum(jnp.sum(FA, axis=0, keepdims=True) - 1.0, 0.0) + 1.0  # [1, Nf]
    fnc_denom = (jnp.maximum(jnp.sum(FA / fa_colnorm, axis=1, keepdims=True) - 1.0,
                             0.0) + 1.0)                                           # [Ns, 1]

    eye_ns = _eye(ns)
    eye_nf = _eye(nf)

    # struct GCN adjacency and its D^{-1/2}(A+I)D^{-1/2} normalization (shared
    # by both layers -> computed once).
    struct_adj2 = jnp.maximum(struct_adj - eye_ns * 10000.0, 0.0) + eye_ns
    s_post = struct_adj2 + eye_ns
    s_d = jax.lax.rsqrt(jnp.sum(jnp.abs(s_post), axis=-1, keepdims=True))          # [Ns, 1]

    col2 = jax.lax.broadcasted_iota(jnp.int32, (n, 2), 1)   # helper for outer-sum build

    # ---------- two GraphEncoderTLCore layers, unrolled ----------
    for l in range(2):
        fgw = fgw_ref[l]; fgb = fgb_ref[l]      # fnc GCN weight / bias   [HP,HP] / [1,HP]
        sgw = sgw_ref[l]; sgb = sgb_ref[l]      # struct GCN weight/bias
        gw = gw_ref[l];  ga = ga_ref[l]         # SPGAT W [HP,HP], a [2,HP]

        struct_emb = _mm(sa_n_t, feat)          # [Ns, HP]
        fnc_emb = _mm(fa_n_t, struct_emb)       # [Nf, HP]

        # functional GCN (adjacency depends on fnc_emb -> per layer)
        fnc_adj = jax.nn.sigmoid(_mm_nt(fnc_emb, fnc_emb)) + eye_nf
        f_post = fnc_adj + eye_nf
        f_d = jax.lax.rsqrt(jnp.sum(jnp.abs(f_post), axis=-1, keepdims=True))
        fnc_emb = f_d * _mm(f_post, f_d * _mm(fnc_emb, fgw)) + fgb

        fnc_message = _mm(FA, fnc_emb) / fnc_denom              # [Ns, HP]
        # NOTE: r_f = sigmoid(l_c(...)) in the torch module never affects the
        # returned raw_feat, so it is not computed here.
        struct_emb = struct_emb + 0.15 * fnc_message

        # struct GCN (normalization hoisted above)
        struct_emb = s_d * _mm(s_post, s_d * _mm(struct_emb, sgw)) + sgb

        struct_message = _mm(SA, struct_emb)                    # [N, HP]
        # NOTE: r_s = sigmoid(l_s(...)) also never affects the output.
        feat = feat + 0.5 * struct_message

        # ---- SPGAT (dense-mask formulation of the sparse edge attention) ----
        h = _mm(feat, gw)                                       # [N, HP]
        # one MXU pass for both attention projections: [N,HP] x [HP,2]
        ha = _mm_nt(h, ga)                                      # col0 = a_src.h_i, col1 = a_dst.h_j
        # outer sum e[i,j] = ha[i,0] + ha[j,1] via a K=2 matmul (no transposes)
        left = jnp.where(col2 == 0, ha, 1.0)                    # [c_i, 1]
        right = jnp.where(col2 == 1, ha, 1.0)                   # [1,  r_j]
        e = _mm_nt(left, right)                                 # [N, N]
        e = jnp.where(e > 0, e, ALPHA * e)                      # LeakyReLU
        e_m = jnp.where(mask > 0, e, -1e30)                     # only real edges participate
        # per-row max (identical after the rowsum division; flash-ready)
        row_max = jnp.max(e_m, axis=1, keepdims=True)           # [N, 1]
        ev = jnp.where(mask > 0, jnp.exp(e_m - row_max), 0.0)   # per-edge exp attention
        # TODO(synk): edge-value dropout is identity (eval mode), matching inference.
        rowsum = jnp.sum(ev, axis=1, keepdims=True)             # e_rowsum [N, 1]
        h_prime = _mm(ev, h) / (rowsum + 1e-15)                 # [N, HP]
        feat = jnp.where(h_prime > 0, h_prime,
                         jnp.exp(jnp.minimum(h_prime, 0.0)) - 1.0)   # ELU

    # TODO(synk): at production N the SPGAT block should be row-tiled with an
    # online softmax (grid over query rows, 'parallel' semantics) and bf16 MXU
    # operands on v6e/v7x; at these toy sizes the dense single-shot form is
    # launch-bound and kept whole.
    out_ref[...] = feat


# ------------------------------ wrapper / glue -------------------------------
def _pad_last(x, hp=HP):      # zero-pad last (feature) dim to hp
    return jnp.pad(x, ((0, 0), (0, hp - x.shape[-1])))


def _pad_square(w, hp=HP):    # zero-pad [H,H] weight to [hp,hp]
    return jnp.pad(w, ((0, hp - w.shape[0]), (0, hp - w.shape[1])))


def graph_encoder_tl_forward(params, node_f, type_f, length_f, lane_f,
                             adj_mask, struct_assign, fnc_assign, struct_adj):
    node_emb = params["node_emb"][node_f]
    type_emb = params["type_emb"][type_f]
    length_emb = params["length_emb"][length_f]
    lane_emb = params["lane_emb"][lane_f]
    raw_feat = jnp.concatenate([lane_emb, type_emb, length_emb, node_emb], axis=1)
    n, h_dim = raw_feat.shape
    ns = struct_assign.shape[1]
    nf = fnc_assign.shape[1]

    raw_feat_p = _pad_last(raw_feat)                      # [N, HP], pad cols == 0

    def stack_pad(name, pad_fn):
        return jnp.stack([pad_fn(params["layer1"][name]),
                          pad_fn(params["layer2"][name])], axis=0)

    fgw = stack_pad("fnc_gcn_w", _pad_square)             # [2, HP, HP]
    fgb = stack_pad("fnc_gcn_b", _pad_last)               # [2, 1,  HP]
    sgw = stack_pad("struct_gcn_w", _pad_square)
    sgb = stack_pad("struct_gcn_b", _pad_last)
    gw = stack_pad("gat_w", _pad_square)
    ga = stack_pad("gat_a", _pad_last)                    # [2, 2, HP]

    args = (struct_assign.T, fnc_assign.T, struct_assign, fnc_assign,
            struct_adj, adj_mask, raw_feat_p, fgw, fgb, sgw, sgb, gw, ga)

    vmem = lambda: pl.BlockSpec(memory_space=pltpu.MemorySpace.VMEM)

    # rough advisory cost for the XLA scheduler (2 layers, matmul-dominated)
    flops = int(2 * 2 * (ns * n * HP + nf * ns * HP + nf * nf * HP + nf * HP * HP
                         + ns * nf * HP + ns * HP * HP + n * ns * HP
                         + n * HP * HP + 2 * n * HP + 2 * n * n + n * n * HP))
    transcendentals = int(2 * (nf * nf + nf + ns + 3 * n * n))
    bytes_accessed = int(sum(int(a.size) for a in args) * 4 + n * HP * 4)

    out_p = pl.pallas_call(
        fused_tl_kernel,
        out_shape=jax.ShapeDtypeStruct((n, HP), jnp.float32),
        in_specs=[vmem() for _ in args],
        out_specs=vmem(),
        compiler_params=pltpu.CompilerParams(
            vmem_limit_bytes=32 * 1024 * 1024),
        cost_estimate=pl.CostEstimate(flops=flops,
                                      transcendentals=transcendentals,
                                      bytes_accessed=bytes_accessed),
    )(*args)
    return out_p[:, :h_dim]                               # strip lane padding


# ---------------------------------- main --------------------------------------
if __name__ == "__main__":
    key = jax.random.PRNGKey(0)

    # small shapes consistent with the module
    N, NS, NF, H = 64, 16, 8, 32
    node_num, type_num, length_num, lane_num = 20, 6, 10, 5
    node_dims, type_dims, length_dims, lane_dims = 16, 4, 8, 4   # sum == H

    ks = list(jax.random.split(key, 24))

    def uni(k, shape, lo=-0.5, hi=0.5):
        return jax.random.uniform(k, shape, jnp.float32, lo, hi)

    def make_layer(k):
        k1, k2, k3, k4, k5, k6 = jax.random.split(k, 6)
        return {
            "fnc_gcn_w": uni(k1, (H, H)),
            "fnc_gcn_b": uni(k2, (1, H)),
            "struct_gcn_w": uni(k3, (H, H)),
            "struct_gcn_b": uni(k4, (1, H)),
            # xavier_normal-ish init for SPGAT W and a (a stored as [2, H]:
            # row 0 = first half of torch `a`, row 1 = second half)
            "gat_w": jax.random.normal(k5, (H, H), jnp.float32)
                     * (1.414 * (2.0 / (H + H)) ** 0.5),
            "gat_a": jax.random.normal(k6, (2, H), jnp.float32)
                     * (1.414 * (2.0 / (1 + 2 * H)) ** 0.5),
        }

    params = {
        "node_emb": jax.random.normal(ks[0], (node_num, node_dims), jnp.float32),
        "type_emb": jax.random.normal(ks[1], (type_num, type_dims), jnp.float32),
        "length_emb": jax.random.normal(ks[2], (length_num, length_dims), jnp.float32),
        "lane_emb": jax.random.normal(ks[3], (lane_num, lane_dims), jnp.float32),
        "layer1": make_layer(ks[4]),
        "layer2": make_layer(ks[5]),
    }

    struct_assign = jax.nn.softmax(jax.random.normal(ks[6], (N, NS), jnp.float32), -1)
    fnc_assign = jax.nn.softmax(jax.random.normal(ks[7], (NS, NF), jnp.float32), -1)
    struct_adj = jax.random.uniform(ks[8], (NS, NS), jnp.float32)

    # dense 0/1 edge mask standing in for the sparse COO raw adjacency
    adj_mask = (jax.random.uniform(ks[9], (N, N), jnp.float32) < 0.2).astype(jnp.float32)
    adj_mask = jnp.maximum(adj_mask, jnp.eye(N, dtype=jnp.float32))  # self loops

    node_f = jax.random.randint(ks[10], (N,), 0, node_num)
    type_f = jax.random.randint(ks[11], (N,), 0, type_num)
    length_f = jax.random.randint(ks[12], (N,), 0, length_num)
    lane_f = jax.random.randint(ks[13], (N,), 0, lane_num)

    out = graph_encoder_tl_forward(params, node_f, type_f, length_f, lane_f,
                                   adj_mask, struct_assign, fnc_assign, struct_adj)
    out = jax.block_until_ready(out)
    assert out.shape == (N, H)
    assert bool(jnp.all(jnp.isfinite(out)))
    print("KERNEL_OK")
</pallas_src>

<mosaic_0001>
module attributes {stable_mosaic.version = 11 : i64} {
  func.func @fused_tl_kernel(%arg0: memref<16x64xf32, #tpu.memory_space<vmem>>, %arg1: memref<8x16xf32, #tpu.memory_space<vmem>>, %arg2: memref<64x16xf32, #tpu.memory_space<vmem>>, %arg3: memref<16x8xf32, #tpu.memory_space<vmem>>, %arg4: memref<16x16xf32, #tpu.memory_space<vmem>>, %arg5: memref<64x64xf32, #tpu.memory_space<vmem>>, %arg6: memref<64x128xf32, #tpu.memory_space<vmem>>, %arg7: memref<2x128x128xf32, #tpu.memory_space<vmem>>, %arg8: memref<2x1x128xf32, #tpu.memory_space<vmem>>, %arg9: memref<2x128x128xf32, #tpu.memory_space<vmem>>, %arg10: memref<2x1x128xf32, #tpu.memory_space<vmem>>, %arg11: memref<2x128x128xf32, #tpu.memory_space<vmem>>, %arg12: memref<2x2x128xf32, #tpu.memory_space<vmem>>, %arg13: memref<64x128xf32, #tpu.memory_space<vmem>>) attributes {dimension_semantics = [], scalar_prefetch = 0 : i64, scratch_operands = 0 : i64, tpu.core_type = #tpu.core_type<tc>} {
    %c0 = arith.constant 0 : index
    %c0_0 = arith.constant 0 : index
    %0 = vector.load %arg0[%c0, %c0_0] : memref<16x64xf32, #tpu.memory_space<vmem>>, vector<16x64xf32>
    %c0_1 = arith.constant 0 : index
    %c0_2 = arith.constant 0 : index
    %1 = vector.load %arg1[%c0_1, %c0_2] : memref<8x16xf32, #tpu.memory_space<vmem>>, vector<8x16xf32>
    %c0_3 = arith.constant 0 : index
    %c0_4 = arith.constant 0 : index
    %2 = vector.load %arg2[%c0_3, %c0_4] : memref<64x16xf32, #tpu.memory_space<vmem>>, vector<64x16xf32>
    %c0_5 = arith.constant 0 : index
    %c0_6 = arith.constant 0 : index
    %3 = vector.load %arg3[%c0_5, %c0_6] : memref<16x8xf32, #tpu.memory_space<vmem>>, vector<16x8xf32>
    %c0_7 = arith.constant 0 : index
    %c0_8 = arith.constant 0 : index
    %4 = vector.load %arg4[%c0_7, %c0_8] : memref<16x16xf32, #tpu.memory_space<vmem>>, vector<16x16xf32>
    %c0_9 = arith.constant 0 : index
    %c0_10 = arith.constant 0 : index
    %5 = vector.load %arg5[%c0_9, %c0_10] : memref<64x64xf32, #tpu.memory_space<vmem>>, vector<64x64xf32>
    %c0_11 = arith.constant 0 : index
    %c0_12 = arith.constant 0 : index
    %6 = vector.load %arg6[%c0_11, %c0_12] : memref<64x128xf32, #tpu.memory_space<vmem>>, vector<64x128xf32>
    %cst = arith.constant dense<0.000000e+00> : vector<16xf32>
    %7 = vector.multi_reduction <add>, %0, %cst [1] : vector<16x64xf32> to vector<16xf32>
    %8 = vector.shape_cast %7 : vector<16xf32> to vector<16x1xf32>
    %cst_13 = arith.constant 1.000000e+00 : f32
    %9 = vector.broadcast %cst_13 : f32 to vector<16x1xf32>
    %10 = arith.subf %8, %9 : vector<16x1xf32>
    %cst_14 = arith.constant 0.000000e+00 : f32
    %11 = vector.broadcast %cst_14 : f32 to vector<16x1xf32>
    %12 = arith.maximumf %10, %11 : vector<16x1xf32>
    %cst_15 = arith.constant 1.000000e+00 : f32
    %13 = vector.broadcast %cst_15 : f32 to vector<16x1xf32>
    %14 = arith.addf %12, %13 : vector<16x1xf32>
    %15 = vector.broadcast %14 : vector<16x1xf32> to vector<16x64xf32>
    %16 = arith.divf %0, %15 : vector<16x64xf32>
    %cst_16 = arith.constant dense<0.000000e+00> : vector<8xf32>
    %17 = vector.multi_reduction <add>, %1, %cst_16 [1] : vector<8x16xf32> to vector<8xf32>
    %18 = vector.shape_cast %17 : vector<8xf32> to vector<8x1xf32>
    %cst_17 = arith.constant 1.000000e+00 : f32
    %19 = vector.broadcast %cst_17 : f32 to vector<8x1xf32>
    %20 = arith.subf %18, %19 : vector<8x1xf32>
    %cst_18 = arith.constant 0.000000e+00 : f32
    %21 = vector.broadcast %cst_18 : f32 to vector<8x1xf32>
    %22 = arith.maximumf %20, %21 : vector<8x1xf32>
    %cst_19 = arith.constant 1.000000e+00 : f32
    %23 = vector.broadcast %cst_19 : f32 to vector<8x1xf32>
    %24 = arith.addf %22, %23 : vector<8x1xf32>
    %25 = vector.broadcast %24 : vector<8x1xf32> to vector<8x16xf32>
    %26 = arith.divf %1, %25 : vector<8x16xf32>
    %cst_20 = arith.constant dense<0.000000e+00> : vector<8xf32>
    %27 = vector.multi_reduction <add>, %3, %cst_20 [0] : vector<16x8xf32> to vector<8xf32>
    %28 = vector.shape_cast %27 : vector<8xf32> to vector<1x8xf32>
    %cst_21 = arith.constant 1.000000e+00 : f32
    %29 = vector.broadcast %cst_21 : f32 to vector<1x8xf32>
    %30 = arith.subf %28, %29 : vector<1x8xf32>
    %cst_22 = arith.constant 0.000000e+00 : f32
    %31 = vector.broadcast %cst_22 : f32 to vector<1x8xf32>
    %32 = arith.maximumf %30, %31 : vector<1x8xf32>
    %cst_23 = arith.constant 1.000000e+00 : f32
    %33 = vector.broadcast %cst_23 : f32 to vector<1x8xf32>
    %34 = arith.addf %32, %33 : vector<1x8xf32>
    %35 = vector.broadcast %34 : vector<1x8xf32> to vector<16x8xf32>
    %36 = arith.divf %3, %35 : vector<16x8xf32>
    %cst_24 = arith.constant dense<0.000000e+00> : vector<16xf32>
    %37 = vector.multi_reduction <add>, %36, %cst_24 [1] : vector<16x8xf32> to vector<16xf32>
    %38 = vector.shape_cast %37 : vector<16xf32> to vector<16x1xf32>
    %cst_25 = arith.constant 1.000000e+00 : f32
    %39 = vector.broadcast %cst_25 : f32 to vector<16x1xf32>
    %40 = arith.subf %38, %39 : vector<16x1xf32>
    %cst_26 = arith.constant 0.000000e+00 : f32
    %41 = vector.broadcast %cst_26 : f32 to vector<16x1xf32>
    %42 = arith.maximumf %40, %41 : vector<16x1xf32>
    %cst_27 = arith.constant 1.000000e+00 : f32
    %43 = vector.broadcast %cst_27 : f32 to vector<16x1xf32>
    %44 = arith.addf %42, %43 : vector<16x1xf32>
    %45 = tpu.iota {dimensions = array<i32: 0>} : vector<16x16xi32>
    %46 = tpu.iota {dimensions = array<i32: 1>} : vector<16x16xi32>
    %47 = arith.cmpi eq, %45, %46 : vector<16x16xi32>
    %48 = arith.extui %47 : vector<16x16xi1> to vector<16x16xi32>
    %49 = arith.sitofp %48 : vector<16x16xi32> to vector<16x16xf32>
    %50 = tpu.iota {dimensions = array<i32: 0>} : vector<8x8xi32>
    %51 = tpu.iota {dimensions = array<i32: 1>} : vector<8x8xi32>
    %52 = arith.cmpi eq, %50, %51 : vector<8x8xi32>
    %53 = arith.extui %52 : vector<8x8xi1> to vector<8x8xi32>
    %54 = arith.sitofp %53 : vector<8x8xi32> to vector<8x8xf32>
    %cst_28 = arith.constant 1.000000e+04 : f32
    %55 = vector.broadcast %cst_28 : f32 to vector<16x16xf32>
    %56 = arith.mulf %49, %55 : vector<16x16xf32>
    %57 = arith.subf %4, %56 : vector<16x16xf32>
    %cst_29 = arith.constant 0.000000e+00 : f32
    %58 = vector.broadcast %cst_29 : f32 to vector<16x16xf32>
    %59 = arith.maximumf %57, %58 : vector<16x16xf32>
    %60 = arith.addf %59, %49 : vector<16x16xf32>
    %61 = arith.addf %60, %49 : vector<16x16xf32>
    %62 = math.absf %61 : vector<16x16xf32>
    %cst_30 = arith.constant dense<0.000000e+00> : vector<16xf32>
    %63 = vector.multi_reduction <add>, %62, %cst_30 [1] : vector<16x16xf32> to vector<16xf32>
    %64 = vector.shape_cast %63 : vector<16xf32> to vector<16x1xf32>
    %65 = math.rsqrt %64 : vector<16x1xf32>
    %66 = tpu.iota {dimensions = array<i32: 1>} : vector<64x2xi32>
    %c0_31 = arith.constant 0 : index
    %c0_32 = arith.constant 0 : index
    %c0_33 = arith.constant 0 : index
    %67 = vector.load %arg7[%c0_31, %c0_32, %c0_33] : memref<2x128x128xf32, #tpu.memory_space<vmem>>, vector<1x128x128xf32>
    %68 = vector.shape_cast %67 : vector<1x128x128xf32> to vector<128x128xf32>
    %c0_34 = arith.constant 0 : index
    %c0_35 = arith.constant 0 : index
    %c0_36 = arith.constant 0 : index
    %69 = vector.load %arg8[%c0_34, %c0_35, %c0_36] : memref<2x1x128xf32, #tpu.memory_space<vmem>>, vector<1x1x128xf32>
    %70 = vector.shape_cast %69 : vector<1x1x128xf32> to vector<1x128xf32>
    %c0_37 = arith.constant 0 : index
    %c0_38 = arith.constant 0 : index
    %c0_39 = arith.constant 0 : index
    %71 = vector.load %arg9[%c0_37, %c0_38, %c0_39] : memref<2x128x128xf32, #tpu.memory_space<vmem>>, vector<1x128x128xf32>
    %72 = vector.shape_cast %71 : vector<1x128x128xf32> to vector<128x128xf32>
    %c0_40 = arith.constant 0 : index
    %c0_41 = arith.constant 0 : index
    %c0_42 = arith.constant 0 : index
    %73 = vector.load %arg10[%c0_40, %c0_41, %c0_42] : memref<2x1x128xf32, #tpu.memory_space<vmem>>, vector<1x1x128xf32>
    %74 = vector.shape_cast %73 : vector<1x1x128xf32> to vector<1x128xf32>
    %c0_43 = arith.constant 0 : index
    %c0_44 = arith.constant 0 : index
    %c0_45 = arith.constant 0 : index
    %75 = vector.load %arg11[%c0_43, %c0_44, %c0_45] : memref<2x128x128xf32, #tpu.memory_space<vmem>>, vector<1x128x128xf32>
    %76 = vector.shape_cast %75 : vector<1x128x128xf32> to vector<128x128xf32>
    %c0_46 = arith.constant 0 : index
    %c0_47 = arith.constant 0 : index
    %c0_48 = arith.constant 0 : index
    %77 = vector.load %arg12[%c0_46, %c0_47, %c0_48] : memref<2x2x128xf32, #tpu.memory_space<vmem>>, vector<1x2x128xf32>
    %78 = vector.shape_cast %77 : vector<1x2x128xf32> to vector<2x128xf32>
    %cst_49 = arith.constant dense<0.000000e+00> : vector<16x128xf32>
    %79 = tpu.matmul %16, %6, %cst_49 {dimension_numbers = #tpu.dot_dimension_numbers<[1], [0], [0], [1], [0, 0, 1, 1], [], []>} : vector<16x64xf32>, vector<64x128xf32>, vector<16x128xf32> -> vector<16x128xf32>
    %cst_50 = arith.constant dense<0.000000e+00> : vector<8x128xf32>
    %80 = tpu.matmul %26, %79, %cst_50 {dimension_numbers = #tpu.dot_dimension_numbers<[1], [0], [0], [1], [0, 0, 1, 1], [], []>} : vector<8x16xf32>, vector<16x128xf32>, vector<8x128xf32> -> vector<8x128xf32>
    %cst_51 = arith.constant dense<0.000000e+00> : vector<8x8xf32>
    %81 = tpu.matmul %80, %80, %cst_51 {dimension_numbers = #tpu.dot_dimension_numbers<[1], [1], [0], [0], [0, 0, 1, 0], [], []>} : vector<8x128xf32>, vector<8x128xf32>, vector<8x8xf32> -> vector<8x8xf32>
    %82 = arith.negf %81 : vector<8x8xf32>
    %83 = math.exp %82 : vector<8x8xf32>
    %cst_52 = arith.constant 1.000000e+00 : f32
    %84 = vector.broadcast %cst_52 : f32 to vector<8x8xf32>
    %85 = arith.addf %84, %83 : vector<8x8xf32>
    %86 = arith.divf %84, %85 : vector<8x8xf32>
    %87 = arith.addf %86, %54 : vector<8x8xf32>
    %88 = arith.addf %87, %54 : vector<8x8xf32>
    %89 = math.absf %88 : vector<8x8xf32>
    %cst_53 = arith.constant dense<0.000000e+00> : vector<8xf32>
    %90 = vector.multi_reduction <add>, %89, %cst_53 [1] : vector<8x8xf32> to vector<8xf32>
    %91 = vector.shape_cast %90 : vector<8xf32> to vector<8x1xf32>
    %92 = math.rsqrt %91 : vector<8x1xf32>
    %cst_54 = arith.constant dense<0.000000e+00> : vector<8x128xf32>
    %93 = tpu.matmul %80, %68, %cst_54 {dimension_numbers = #tpu.dot_dimension_numbers<[1], [0], [0], [1], [0, 0, 1, 1], [], []>} : vector<8x128xf32>, vector<128x128xf32>, vector<8x128xf32> -> vector<8x128xf32>
    %94 = vector.broadcast %92 : vector<8x1xf32> to vector<8x128xf32>
    %95 = arith.mulf %94, %93 : vector<8x128xf32>
    %cst_55 = arith.constant dense<0.000000e+00> : vector<8x128xf32>
    %96 = tpu.matmul %88, %95, %cst_55 {dimension_numbers = #tpu.dot_dimension_numbers<[1], [0], [0], [1], [0, 0, 1, 1], [], []>} : vector<8x8xf32>, vector<8x128xf32>, vector<8x128xf32> -> vector<8x128xf32>
    %97 = vector.broadcast %92 : vector<8x1xf32> to vector<8x128xf32>
    %98 = arith.mulf %97, %96 : vector<8x128xf32>
    %99 = vector.broadcast %70 : vector<1x128xf32> to vector<8x128xf32>
    %100 = arith.addf %98, %99 : vector<8x128xf32>
    %cst_56 = arith.constant dense<0.000000e+00> : vector<16x128xf32>
    %101 = tpu.matmul %3, %100, %cst_56 {dimension_numbers = #tpu.dot_dimension_numbers<[1], [0], [0], [1], [0, 0, 1, 1], [], []>} : vector<16x8xf32>, vector<8x128xf32>, vector<16x128xf32> -> vector<16x128xf32>
    %102 = vector.broadcast %44 : vector<16x1xf32> to vector<16x128xf32>
    %103 = arith.divf %101, %102 : vector<16x128xf32>
    %cst_57 = arith.constant 1.500000e-01 : f32
    %104 = vector.broadcast %cst_57 : f32 to vector<16x128xf32>
    %105 = arith.mulf %104, %103 : vector<16x128xf32>
    %106 = arith.addf %79, %105 : vector<16x128xf32>
    %cst_58 = arith.constant dense<0.000000e+00> : vector<16x128xf32>
    %107 = tpu.matmul %106, %72, %cst_58 {dimension_numbers = #tpu.dot_dimension_numbers<[1], [0], [0], [1], [0, 0, 1, 1], [], []>} : vector<16x128xf32>, vector<128x128xf32>, vector<16x128xf32> -> vector<16x128xf32>
    %108 = vector.broadcast %65 : vector<16x1xf32> to vector<16x128xf32>
    %109 = arith.mulf %108, %107 : vector<16x128xf32>
    %cst_59 = arith.constant dense<0.000000e+00> : vector<16x128xf32>
    %110 = tpu.matmul %61, %109, %cst_59 {dimension_numbers = #tpu.dot_dimension_numbers<[1], [0], [0], [1], [0, 0, 1, 1], [], []>} : vector<16x16xf32>, vector<16x128xf32>, vector<16x128xf32> -> vector<16x128xf32>
    %111 = vector.broadcast %65 : vector<16x1xf32> to vector<16x128xf32>
    %112 = arith.mulf %111, %110 : vector<16x128xf32>
    %113 = vector.broadcast %74 : vector<1x128xf32> to vector<16x128xf32>
    %114 = arith.addf %112, %113 : vector<16x128xf32>
    %cst_60 = arith.constant dense<0.000000e+00> : vector<64x128xf32>
    %115 = tpu.matmul %2, %114, %cst_60 {dimension_numbers = #tpu.dot_dimension_numbers<[1], [0], [0], [1], [0, 0, 1, 1], [], []>} : vector<64x16xf32>, vector<16x128xf32>, vector<64x128xf32> -> vector<64x128xf32>
    %cst_61 = arith.constant 5.000000e-01 : f32
    %116 = vector.broadcast %cst_61 : f32 to vector<64x128xf32>
    %117 = arith.mulf %116, %115 : vector<64x128xf32>
    %118 = arith.addf %6, %117 : vector<64x128xf32>
    %cst_62 = arith.constant dense<0.000000e+00> : vector<64x128xf32>
    %119 = tpu.matmul %118, %76, %cst_62 {dimension_numbers = #tpu.dot_dimension_numbers<[1], [0], [0], [1], [0, 0, 1, 1], [], []>} : vector<64x128xf32>, vector<128x128xf32>, vector<64x128xf32> -> vector<64x128xf32>
    %cst_63 = arith.constant dense<0.000000e+00> : vector<64x2xf32>
    %120 = tpu.matmul %119, %78, %cst_63 {dimension_numbers = #tpu.dot_dimension_numbers<[1], [1], [0], [0], [0, 0, 1, 0], [], []>} : vector<64x128xf32>, vector<2x128xf32>, vector<64x2xf32> -> vector<64x2xf32>
    %c0_i32 = arith.constant 0 : i32
    %121 = vector.broadcast %c0_i32 : i32 to vector<64x2xi32>
    %122 = arith.cmpi eq, %66, %121 : vector<64x2xi32>
    %cst_64 = arith.constant 1.000000e+00 : f32
    %123 = vector.broadcast %cst_64 : f32 to vector<64x2xf32>
    %124 = arith.select %122, %120, %123 : vector<64x2xi1>, vector<64x2xf32>
    %c1_i32 = arith.constant 1 : i32
    %125 = vector.broadcast %c1_i32 : i32 to vector<64x2xi32>
    %126 = arith.cmpi eq, %66, %125 : vector<64x2xi32>
    %cst_65 = arith.constant 1.000000e+00 : f32
    %127 = vector.broadcast %cst_65 : f32 to vector<64x2xf32>
    %128 = arith.select %126, %120, %127 : vector<64x2xi1>, vector<64x2xf32>
    %cst_66 = arith.constant dense<0.000000e+00> : vector<64x64xf32>
    %129 = tpu.matmul %124, %128, %cst_66 {dimension_numbers = #tpu.dot_dimension_numbers<[1], [1], [0], [0], [0, 0, 1, 0], [], []>} : vector<64x2xf32>, vector<64x2xf32>, vector<64x64xf32> -> vector<64x64xf32>
    %cst_67 = arith.constant 0.000000e+00 : f32
    %130 = vector.broadcast %cst_67 : f32 to vector<64x64xf32>
    %131 = arith.cmpf ogt, %129, %130 : vector<64x64xf32>
    %cst_68 = arith.constant 2.000000e-01 : f32
    %132 = vector.broadcast %cst_68 : f32 to vector<64x64xf32>
    %133 = arith.mulf %132, %129 : vector<64x64xf32>
    %134 = arith.select %131, %129, %133 : vector<64x64xi1>, vector<64x64xf32>
    %cst_69 = arith.constant 0.000000e+00 : f32
    %135 = vector.broadcast %cst_69 : f32 to vector<64x64xf32>
    %136 = arith.cmpf ogt, %5, %135 : vector<64x64xf32>
    %cst_70 = arith.constant -1.000000e+30 : f32
    %137 = vector.broadcast %cst_70 : f32 to vector<64x64xf32>
    %138 = arith.select %136, %134, %137 : vector<64x64xi1>, vector<64x64xf32>
    %cst_71 = arith.constant dense<0xFF800000> : vector<64xf32>
    %139 = vector.multi_reduction <maximumf>, %138, %cst_71 [1] : vector<64x64xf32> to vector<64xf32>
    %140 = vector.shape_cast %139 : vector<64xf32> to vector<64x1xf32>
    %cst_72 = arith.constant 0.000000e+00 : f32
    %141 = vector.broadcast %cst_72 : f32 to vector<64x64xf32>
    %142 = arith.cmpf ogt, %5, %141 : vector<64x64xf32>
    %143 = vector.broadcast %140 : vector<64x1xf32> to vector<64x64xf32>
    %144 = arith.subf %138, %143 : vector<64x64xf32>
    %145 = math.exp %144 : vector<64x64xf32>
    %cst_73 = arith.constant 0.000000e+00 : f32
    %146 = vector.broadcast %cst_73 : f32 to vector<64x64xf32>
    %147 = arith.select %142, %145, %146 : vector<64x64xi1>, vector<64x64xf32>
    %cst_74 = arith.constant dense<0.000000e+00> : vector<64xf32>
    %148 = vector.multi_reduction <add>, %147, %cst_74 [1] : vector<64x64xf32> to vector<64xf32>
    %149 = vector.shape_cast %148 : vector<64xf32> to vector<64x1xf32>
    %cst_75 = arith.constant dense<0.000000e+00> : vector<64x128xf32>
    %150 = tpu.matmul %147, %119, %cst_75 {dimension_numbers = #tpu.dot_dimension_numbers<[1], [0], [0], [1], [0, 0, 1, 1], [], []>} : vector<64x64xf32>, vector<64x128xf32>, vector<64x128xf32> -> vector<64x128xf32>
    %cst_76 = arith.constant 1.000000e-15 : f32
    %151 = vector.broadcast %cst_76 : f32 to vector<64x1xf32>
    %152 = arith.addf %149, %151 : vector<64x1xf32>
    %153 = vector.broadcast %152 : vector<64x1xf32> to vector<64x128xf32>
    %154 = arith.divf %150, %153 : vector<64x128xf32>
    %cst_77 = arith.constant 0.000000e+00 : f32
    %155 = vector.broadcast %cst_77 : f32 to vector<64x128xf32>
    %156 = arith.cmpf ogt, %154, %155 : vector<64x128xf32>
    %cst_78 = arith.constant 0.000000e+00 : f32
    %157 = vector.broadcast %cst_78 : f32 to vector<64x128xf32>
    %158 = arith.minimumf %154, %157 : vector<64x128xf32>
    %159 = math.exp %158 : vector<64x128xf32>
    %cst_79 = arith.constant 1.000000e+00 : f32
    %160 = vector.broadcast %cst_79 : f32 to vector<64x128xf32>
    %161 = arith.subf %159, %160 : vector<64x128xf32>
    %162 = arith.select %156, %154, %161 : vector<64x128xi1>, vector<64x128xf32>
    %c1 = arith.constant 1 : index
    %c0_80 = arith.constant 0 : index
    %c0_81 = arith.constant 0 : index
    %163 = vector.load %arg7[%c1, %c0_80, %c0_81] : memref<2x128x128xf32, #tpu.memory_space<vmem>>, vector<1x128x128xf32>
    %164 = vector.shape_cast %163 : vector<1x128x128xf32> to vector<128x128xf32>
    %c1_82 = arith.constant 1 : index
    %c0_83 = arith.constant 0 : index
    %c0_84 = arith.constant 0 : index
    %165 = vector.load %arg8[%c1_82, %c0_83, %c0_84] : memref<2x1x128xf32, #tpu.memory_space<vmem>>, vector<1x1x128xf32>
    %166 = vector.shape_cast %165 : vector<1x1x128xf32> to vector<1x128xf32>
    %c1_85 = arith.constant 1 : index
    %c0_86 = arith.constant 0 : index
    %c0_87 = arith.constant 0 : index
    %167 = vector.load %arg9[%c1_85, %c0_86, %c0_87] : memref<2x128x128xf32, #tpu.memory_space<vmem>>, vector<1x128x128xf32>
    %168 = vector.shape_cast %167 : vector<1x128x128xf32> to vector<128x128xf32>
    %c1_88 = arith.constant 1 : index
    %c0_89 = arith.constant 0 : index
    %c0_90 = arith.constant 0 : index
    %169 = vector.load %arg10[%c1_88, %c0_89, %c0_90] : memref<2x1x128xf32, #tpu.memory_space<vmem>>, vector<1x1x128xf32>
    %170 = vector.shape_cast %169 : vector<1x1x128xf32> to vector<1x128xf32>
    %c1_91 = arith.constant 1 : index
    %c0_92 = arith.constant 0 : index
    %c0_93 = arith.constant 0 : index
    %171 = vector.load %arg11[%c1_91, %c0_92, %c0_93] : memref<2x128x128xf32, #tpu.memory_space<vmem>>, vector<1x128x128xf32>
    %172 = vector.shape_cast %171 : vector<1x128x128xf32> to vector<128x128xf32>
    %c1_94 = arith.constant 1 : index
    %c0_95 = arith.constant 0 : index
    %c0_96 = arith.constant 0 : index
    %173 = vector.load %arg12[%c1_94, %c0_95, %c0_96] : memref<2x2x128xf32, #tpu.memory_space<vmem>>, vector<1x2x128xf32>
    %174 = vector.shape_cast %173 : vector<1x2x128xf32> to vector<2x128xf32>
    %cst_97 = arith.constant dense<0.000000e+00> : vector<16x128xf32>
    %175 = tpu.matmul %16, %162, %cst_97 {dimension_numbers = #tpu.dot_dimension_numbers<[1], [0], [0], [1], [0, 0, 1, 1], [], []>} : vector<16x64xf32>, vector<64x128xf32>, vector<16x128xf32> -> vector<16x128xf32>
    %cst_98 = arith.constant dense<0.000000e+00> : vector<8x128xf32>
    %176 = tpu.matmul %26, %175, %cst_98 {dimension_numbers = #tpu.dot_dimension_numbers<[1], [0], [0], [1], [0, 0, 1, 1], [], []>} : vector<8x16xf32>, vector<16x128xf32>, vector<8x128xf32> -> vector<8x128xf32>
    %cst_99 = arith.constant dense<0.000000e+00> : vector<8x8xf32>
    %177 = tpu.matmul %176, %176, %cst_99 {dimension_numbers = #tpu.dot_dimension_numbers<[1], [1], [0], [0], [0, 0, 1, 0], [], []>} : vector<8x128xf32>, vector<8x128xf32>, vector<8x8xf32> -> vector<8x8xf32>
    %178 = arith.negf %177 : vector<8x8xf32>
    %179 = math.exp %178 : vector<8x8xf32>
    %cst_100 = arith.constant 1.000000e+00 : f32
    %180 = vector.broadcast %cst_100 : f32 to vector<8x8xf32>
    %181 = arith.addf %180, %179 : vector<8x8xf32>
    %182 = arith.divf %180, %181 : vector<8x8xf32>
    %183 = arith.addf %182, %54 : vector<8x8xf32>
    %184 = arith.addf %183, %54 : vector<8x8xf32>
    %185 = math.absf %184 : vector<8x8xf32>
    %cst_101 = arith.constant dense<0.000000e+00> : vector<8xf32>
    %186 = vector.multi_reduction <add>, %185, %cst_101 [1] : vector<8x8xf32> to vector<8xf32>
    %187 = vector.shape_cast %186 : vector<8xf32> to vector<8x1xf32>
    %188 = math.rsqrt %187 : vector<8x1xf32>
    %cst_102 = arith.constant dense<0.000000e+00> : vector<8x128xf32>
    %189 = tpu.matmul %176, %164, %cst_102 {dimension_numbers = #tpu.dot_dimension_numbers<[1], [0], [0], [1], [0, 0, 1, 1], [], []>} : vector<8x128xf32>, vector<128x128xf32>, vector<8x128xf32> -> vector<8x128xf32>
    %190 = vector.broadcast %188 : vector<8x1xf32> to vector<8x128xf32>
    %191 = arith.mulf %190, %189 : vector<8x128xf32>
    %cst_103 = arith.constant dense<0.000000e+00> : vector<8x128xf32>
    %192 = tpu.matmul %184, %191, %cst_103 {dimension_numbers = #tpu.dot_dimension_numbers<[1], [0], [0], [1], [0, 0, 1, 1], [], []>} : vector<8x8xf32>, vector<8x128xf32>, vector<8x128xf32> -> vector<8x128xf32>
    %193 = vector.broadcast %188 : vector<8x1xf32> to vector<8x128xf32>
    %194 = arith.mulf %193, %192 : vector<8x128xf32>
    %195 = vector.broadcast %166 : vector<1x128xf32> to vector<8x128xf32>
    %196 = arith.addf %194, %195 : vector<8x128xf32>
    %cst_104 = arith.constant dense<0.000000e+00> : vector<16x128xf32>
    %197 = tpu.matmul %3, %196, %cst_104 {dimension_numbers = #tpu.dot_dimension_numbers<[1], [0], [0], [1], [0, 0, 1, 1], [], []>} : vector<16x8xf32>, vector<8x128xf32>, vector<16x128xf32> -> vector<16x128xf32>
    %198 = vector.broadcast %44 : vector<16x1xf32> to vector<16x128xf32>
    %199 = arith.divf %197, %198 : vector<16x128xf32>
    %cst_105 = arith.constant 1.500000e-01 : f32
    %200 = vector.broadcast %cst_105 : f32 to vector<16x128xf32>
    %201 = arith.mulf %200, %199 : vector<16x128xf32>
    %202 = arith.addf %175, %201 : vector<16x128xf32>
    %cst_106 = arith.constant dense<0.000000e+00> : vector<16x128xf32>
    %203 = tpu.matmul %202, %168, %cst_106 {dimension_numbers = #tpu.dot_dimension_numbers<[1], [0], [0], [1], [0, 0, 1, 1], [], []>} : vector<16x128xf32>, vector<128x128xf32>, vector<16x128xf32> -> vector<16x128xf32>
    %204 = vector.broadcast %65 : vector<16x1xf32> to vector<16x128xf32>
    %205 = arith.mulf %204, %203 : vector<16x128xf32>
    %cst_107 = arith.constant dense<0.000000e+00> : vector<16x128xf32>
    %206 = tpu.matmul %61, %205, %cst_107 {dimension_numbers = #tpu.dot_dimension_numbers<[1], [0], [0], [1], [0, 0, 1, 1], [], []>} : vector<16x16xf32>, vector<16x128xf32>, vector<16x128xf32> -> vector<16x128xf32>
    %207 = vector.broadcast %65 : vector<16x1xf32> to vector<16x128xf32>
    %208 = arith.mulf %207, %206 : vector<16x128xf32>
    %209 = vector.broadcast %170 : vector<1x128xf32> to vector<16x128xf32>
    %210 = arith.addf %208, %209 : vector<16x128xf32>
    %cst_108 = arith.constant dense<0.000000e+00> : vector<64x128xf32>
    %211 = tpu.matmul %2, %210, %cst_108 {dimension_numbers = #tpu.dot_dimension_numbers<[1], [0], [0], [1], [0, 0, 1, 1], [], []>} : vector<64x16xf32>, vector<16x128xf32>, vector<64x128xf32> -> vector<64x128xf32>
    %cst_109 = arith.constant 5.000000e-01 : f32
    %212 = vector.broadcast %cst_109 : f32 to vector<64x128xf32>
    %213 = arith.mulf %212, %211 : vector<64x128xf32>
    %214 = arith.addf %162, %213 : vector<64x128xf32>
    %cst_110 = arith.constant dense<0.000000e+00> : vector<64x128xf32>
    %215 = tpu.matmul %214, %172, %cst_110 {dimension_numbers = #tpu.dot_dimension_numbers<[1], [0], [0], [1], [0, 0, 1, 1], [], []>} : vector<64x128xf32>, vector<128x128xf32>, vector<64x128xf32> -> vector<64x128xf32>
    %cst_111 = arith.constant dense<0.000000e+00> : vector<64x2xf32>
    %216 = tpu.matmul %215, %174, %cst_111 {dimension_numbers = #tpu.dot_dimension_numbers<[1], [1], [0], [0], [0, 0, 1, 0], [], []>} : vector<64x128xf32>, vector<2x128xf32>, vector<64x2xf32> -> vector<64x2xf32>
    %c0_i32_112 = arith.constant 0 : i32
    %217 = vector.broadcast %c0_i32_112 : i32 to vector<64x2xi32>
    %218 = arith.cmpi eq, %66, %217 : vector<64x2xi32>
    %cst_113 = arith.constant 1.000000e+00 : f32
    %219 = vector.broadcast %cst_113 : f32 to vector<64x2xf32>
    %220 = arith.select %218, %216, %219 : vector<64x2xi1>, vector<64x2xf32>
    %c1_i32_114 = arith.constant 1 : i32
    %221 = vector.broadcast %c1_i32_114 : i32 to vector<64x2xi32>
    %222 = arith.cmpi eq, %66, %221 : vector<64x2xi32>
    %cst_115 = arith.constant 1.000000e+00 : f32
    %223 = vector.broadcast %cst_115 : f32 to vector<64x2xf32>
    %224 = arith.select %222, %216, %223 : vector<64x2xi1>, vector<64x2xf32>
    %cst_116 = arith.constant dense<0.000000e+00> : vector<64x64xf32>
    %225 = tpu.matmul %220, %224, %cst_116 {dimension_numbers = #tpu.dot_dimension_numbers<[1], [1], [0], [0], [0, 0, 1, 0], [], []>} : vector<64x2xf32>, vector<64x2xf32>, vector<64x64xf32> -> vector<64x64xf32>
    %cst_117 = arith.constant 0.000000e+00 : f32
    %226 = vector.broadcast %cst_117 : f32 to vector<64x64xf32>
    %227 = arith.cmpf ogt, %225, %226 : vector<64x64xf32>
    %cst_118 = arith.constant 2.000000e-01 : f32
    %228 = vector.broadcast %cst_118 : f32 to vector<64x64xf32>
    %229 = arith.mulf %228, %225 : vector<64x64xf32>
    %230 = arith.select %227, %225, %229 : vector<64x64xi1>, vector<64x64xf32>
    %cst_119 = arith.constant 0.000000e+00 : f32
    %231 = vector.broadcast %cst_119 : f32 to vector<64x64xf32>
    %232 = arith.cmpf ogt, %5, %231 : vector<64x64xf32>
    %cst_120 = arith.constant -1.000000e+30 : f32
    %233 = vector.broadcast %cst_120 : f32 to vector<64x64xf32>
    %234 = arith.select %232, %230, %233 : vector<64x64xi1>, vector<64x64xf32>
    %cst_121 = arith.constant dense<0xFF800000> : vector<64xf32>
    %235 = vector.multi_reduction <maximumf>, %234, %cst_121 [1] : vector<64x64xf32> to vector<64xf32>
    %236 = vector.shape_cast %235 : vector<64xf32> to vector<64x1xf32>
    %cst_122 = arith.constant 0.000000e+00 : f32
    %237 = vector.broadcast %cst_122 : f32 to vector<64x64xf32>
    %238 = arith.cmpf ogt, %5, %237 : vector<64x64xf32>
    %239 = vector.broadcast %236 : vector<64x1xf32> to vector<64x64xf32>
    %240 = arith.subf %234, %239 : vector<64x64xf32>
    %241 = math.exp %240 : vector<64x64xf32>
    %cst_123 = arith.constant 0.000000e+00 : f32
    %242 = vector.broadcast %cst_123 : f32 to vector<64x64xf32>
    %243 = arith.select %238, %241, %242 : vector<64x64xi1>, vector<64x64xf32>
    %cst_124 = arith.constant dense<0.000000e+00> : vector<64xf32>
    %244 = vector.multi_reduction <add>, %243, %cst_124 [1] : vector<64x64xf32> to vector<64xf32>
    %245 = vector.shape_cast %244 : vector<64xf32> to vector<64x1xf32>
    %cst_125 = arith.constant dense<0.000000e+00> : vector<64x128xf32>
    %246 = tpu.matmul %243, %215, %cst_125 {dimension_numbers = #tpu.dot_dimension_numbers<[1], [0], [0], [1], [0, 0, 1, 1], [], []>} : vector<64x64xf32>, vector<64x128xf32>, vector<64x128xf32> -> vector<64x128xf32>
    %cst_126 = arith.constant 1.000000e-15 : f32
    %247 = vector.broadcast %cst_126 : f32 to vector<64x1xf32>
    %248 = arith.addf %245, %247 : vector<64x1xf32>
    %249 = vector.broadcast %248 : vector<64x1xf32> to vector<64x128xf32>
    %250 = arith.divf %246, %249 : vector<64x128xf32>
    %cst_127 = arith.constant 0.000000e+00 : f32
    %251 = vector.broadcast %cst_127 : f32 to vector<64x128xf32>
    %252 = arith.cmpf ogt, %250, %251 : vector<64x128xf32>
    %cst_128 = arith.constant 0.000000e+00 : f32
    %253 = vector.broadcast %cst_128 : f32 to vector<64x128xf32>
    %254 = arith.minimumf %250, %253 : vector<64x128xf32>
    %255 = math.exp %254 : vector<64x128xf32>
    %cst_129 = arith.constant 1.000000e+00 : f32
    %256 = vector.broadcast %cst_129 : f32 to vector<64x128xf32>
    %257 = arith.subf %255, %256 : vector<64x128xf32>
    %258 = arith.select %252, %250, %257 : vector<64x128xi1>, vector<64x128xf32>
    %c0_130 = arith.constant 0 : index
    %c0_131 = arith.constant 0 : index
    %259 = vector.load %arg13[%c0_130, %c0_131] : memref<64x128xf32, #tpu.memory_space<vmem>>, vector<64x128xf32>
    tpu.vector_store %arg13[%c0_130, %c0_131], %258 {strides = array<i32>} : memref<64x128xf32, #tpu.memory_space<vmem>>, vector<64x128xf32>,
    return
  }
}

</mosaic_0001>

<bundles_post_ra>
// kernel: tpu_custom_call.1
= control target key start
LH: loop header
LB: loop body
LE: loop exit
PB: predicated region body
PF: predicated region fallthrough
CT: control target
= control target key end

     0   :  { %18 = vsyncpa [#allocation3], 0  ;;  %s5161_s0 = inlined_call_operand.vmem [shape: f32[16,64], index: 0, kind: input, shape index: {}]   ;;  %s5162_s1 = inlined_call_operand.vmem [shape: f32[8,16], index: 1, kind: input, shape index: {}]   ;;  %s5163_s2 = inlined_call_operand.vmem [shape: f32[64,16], index: 2, kind: input, shape index: {}]   ;;  %s5164_s3 = inlined_call_operand.vmem [shape: f32[16,8], index: 3, kind: input, shape index: {}]   ;;  %s5165_s4 = inlined_call_operand.vmem [shape: f32[16,16], index: 4, kind: input, shape index: {}]   ;;  %s5166_s5 = inlined_call_operand.vmem [shape: f32[64,64], index: 5, kind: input, shape index: {}]   ;;  %s5167_s6 = inlined_call_operand.hbm [shape: f32[64,128], index: 6, kind: input, shape index: {}]   ;;  %s5168_s7 = inlined_call_operand.hbm [shape: f32[2,128,128], index: 7, kind: input, shape index: {}]   ;;  %s5169_s8 = inlined_call_operand.vmem [shape: f32[2,1,128], index: 8, kind: input, shape index: {}]   ;;  %s5170_s9 = inlined_call_operand.hbm [shape: f32[2,128,128], index: 9, kind: input, shape index: {}]   ;;  %s5171_s10 = inlined_call_operand.vmem [shape: f32[2,1,128], index: 10, kind: input, shape index: {}]   ;;  %s5172_s11 = inlined_call_operand.hbm [shape: f32[2,128,128], index: 11, kind: input, shape index: {}]   ;;  %s5173_s12 = inlined_call_operand.vmem [shape: f32[2,2,128], index: 12, kind: input, shape index: {}]   ;;  %s5174_s13 = inlined_call_operand.hbm [shape: f32[64,128], index: 13, kind: output, shape index: {}]  }
   0x1   :  { %19 = vsyncpa [#allocation6], 0 }
   0x2   :  { %20 = vsyncpa [#allocation9], 0 }
   0x3   :  { %21 = vsyncpa [#allocation4], 0  ;;  %s4409_s25 = smov [#allocation5]   ;;  %s4410_s27 = smov [#allocation2]  }
   0x4   :  { %s51_s26 = sshll.u32 %s4409_s25, 4  ;;  %s39_s28 = sshll.u32 %s4410_s27, 4  ;;  %s52_s26 = int_to_ptr.vmem [resolvable:$true] %s51_s26  ;;  %s40_s28 = int_to_ptr.vmem [resolvable:$true] %s39_s28 }
   0x5   :  { %s4309_s29 = scalar_lea.vmem %s52_s26, 4096  ;;  %p4314_p1 = scmp.lt.s32.totalorder %s52_s26, %s52_s26 }
   0x6   :  { %p4310_p0 = scmp.ne.s32.totalorder %s52_s26, %s4309_s29  ;;  %p4315_p2 = scmp.lt.s32.totalorder %s4309_s29, %s4309_s29 }
   0x8   :  { %p4316_p3 = por %p4315_p2, %p4314_p1 }
   0xa   :  { %p4317_p4 = pnand %p4316_p3, %p4310_p0 }
   0xc   :  { %4320 = shalt.err (!%p4317_p4)
}
   0xd   :  { %s4411_s30 = smov 128   ;;  %s4412_s14 = smov 8  }
   0xe   :  { %57 = dma.hbm_to_vmem [thread:$0]  %s5168_s7, 4096, %s52_s26, [#allocation6], %s4411_s30, %s4411_s30, %s4412_s14  }
   0xf   :  { %s4329_s17 = scalar_lea.vmem %s40_s28, 1024  ;;  %p4334_p6 = scmp.lt.s32.totalorder %s40_s28, %s40_s28 }
  0x10   :  { %p4330_p5 = scmp.ne.s32.totalorder %s40_s28, %s4329_s17  ;;  %p4335_p7 = scmp.lt.s32.totalorder %s4329_s17, %s4329_s17 }
  0x12   :  { %p4336_p8 = por %p4335_p7, %p4334_p6 }
  0x14   :  { %p4337_p9 = pnand %p4336_p8, %p4330_p5 }
  0x16   :  { %4340 = shalt.err (!%p4337_p9)
}
  0x17   :  { %45 = dma.hbm_to_vmem [thread:$0]  %s5167_s6, 1024, %s40_s28, [#allocation3], %s4411_s30, %s4411_s30, %s4412_s14  }
  0x18   :  { %s4413_s20 = smov [#allocation7]   ;;  %s4414_s22 = smov [#allocation8]  }
  0x19   :  { %s65_s21 = sshll.u32 %s4413_s20, 4  ;;  %s79_s23 = sshll.u32 %s4414_s22, 4  ;;  %s66_s21 = int_to_ptr.vmem [resolvable:$true] %s65_s21  ;;  %s80_s23 = int_to_ptr.vmem [resolvable:$true] %s79_s23 }
  0x1a   :  { %s4349_s7 = scalar_lea.vmem %s66_s21, 4096  ;;  %p4354_p11 = scmp.lt.s32.totalorder %s66_s21, %s66_s21 }
  0x1b   :  { %p4350_p10 = scmp.ne.s32.totalorder %s66_s21, %s4349_s7  ;;  %p4355_p12 = scmp.lt.s32.totalorder %s4349_s7, %s4349_s7 }
  0x1d   :  { %p4356_p13 = por %p4355_p12, %p4354_p11 }
  0x1f   :  { %p4357_p0 = pnand %p4356_p13, %p4350_p10 }
  0x21   :  { %4360 = shalt.err (!%p4357_p0)
}
  0x22   :  { %71 = dma.hbm_to_vmem [thread:$0]  %s5170_s9, 4096, %s66_s21, [#allocation6], %s4411_s30, %s4411_s30, %s4412_s14  }
  0x23   :  { %s4369_s6 = scalar_lea.vmem %s80_s23, 4096  ;;  %p4374_p2 = scmp.lt.s32.totalorder %s80_s23, %s80_s23 }
  0x24   :  { %p4370_p1 = scmp.ne.s32.totalorder %s80_s23, %s4369_s6  ;;  %p4375_p3 = scmp.lt.s32.totalorder %s4369_s6, %s4369_s6 }
  0x26   :  { %p4376_p4 = por %p4375_p3, %p4374_p2 }
  0x28   :  { %p4377_p5 = pnand %p4376_p4, %p4370_p1 }
  0x2a   :  { %4380 = shalt.err (!%p4377_p5)
}
  0x2b   :  { %85 = dma.hbm_to_vmem [thread:$0]  %s5172_s11, 4096, %s80_s23, [#allocation9], %s4411_s30, %s4411_s30, %s4412_s14  }
  0x2c   :  { %4401 = dma.done.wait [#allocation3], 1024  }
  0x2d   :  { %4402 = vsyncadd [#allocation3], 4294966272 }
  0x2e   :  { %4403 = dma.done.wait [#allocation6], 8192  }
  0x2f   :  { %4404 = vsyncadd [#allocation6], 4294959104 }
  0x30   :  { %4405 = dma.done.wait [#allocation9], 4096  }
  0x31   :  { %4406 = vsyncadd [#allocation9], 4294963200  ;;  %vm131_vm0 = vcmask 523264   ;;  %v100_v0 = vld [vmem:[%s5161_s0] sm:$0xff]  ;;  %v101_v1 = vld [vmem:[%s5161_s0 + $0x8] sm:$0xff]  ;;  %vm148_vm1 = vcmask 130048   ;;  %v185_v58 = vlaneseq }
  0x32   :  { %v132_v2 = vsel %vm131_vm0, %v100_v0, 0.0  ;;  %v135_v3 = vsel %vm131_vm0, %v101_v1, 0.0  ;;  %v4520_v4 = vld [vmem:[#allocation2 + $0x38] sm:$0xff]  ;;  %v4523_v5 = vld [vmem:[#allocation2 + $0x30] sm:$0xff]  ;;  %v4526_v6 = vld [vmem:[#allocation2 + $0x28] sm:$0xff]  ;;  %v4415_v26 = vmov 0.0  }
  0x33   :  { %133 = vadd.xlane.f32.xlu0 %v132_v2  ;;  %3662 = vmatprep.subr.mxu0 %v4520_v4  ;;  %v4530_v7 = vld [vmem:[#allocation2 + $0x20] sm:$0xff]  ;;  %v4534_v8 = vld [vmem:[#allocation2 + $0x18] sm:$0xff]  ;;  %v4538_v9 = vld [vmem:[#allocation2 + $0x10] sm:$0xff]  ;;  %vm4416_vm2 = vmmov 0   ;;  %v4602_v59 = vshrl.u32 %v185_v58, 7  ;;  %v4604_v60 = vand.u32 127, %v185_v58 }
  0x34   :  { %3663 = vmatpush3.msra.mxu0 %v4520_v4  ;;  %v4542_v10 = vld [vmem:[#allocation2 + $0x8] sm:$0xff]  ;;  %v4547_v11 = vld [vmem:[#allocation2] sm:$0xff]  ;;  %3681 = vmatprep.subr.mxu1 %v4415_v26  ;;  %v231_v37 = vld [vmem:[#allocation5 + $0x78] sm:$0xff]  ;;  %vm157_vm4 = vcmask 64512   ;;  %vm5176_vm6 = vcmask 15360  }
  0x35   :  { %3664 = vmatprep.subr.mxu0 %v4523_v5  ;;  %v102_v12 = vld [vmem:[%s5162_s1] sm:$0xff]  ;;  %3685 = vmatprep.mubr.msk.f32.mxu1 %vm4416_vm2, %v4415_v26  ;;  %v230_v38 = vld [vmem:[#allocation5 + $0x70] sm:$0xff]  ;;  %v229_v39 = vld [vmem:[#allocation5 + $0x68] sm:$0xff]  ;;  %vm190_vm3 = vcmp.eq.s32.totalorder %v4602_v59, %v4604_v60  ;;  %vm1268_vm7 = vcmp.eq.s32.totalorder %v4604_v60, 0  ;;  %vm5175_vm8 = vcmp.eq.s32.totalorder %v4604_v60, 1 }
  0x36   :  { %3665 = vmatpush3.msra.mxu0 %v4523_v5  ;;  %v149_v13 = vsel %vm148_vm1, %v102_v12, 0.0  ;;  %v228_v40 = vld [vmem:[#allocation5 + $0x60] sm:$0xff]  ;;  %v227_v41 = vld [vmem:[#allocation5 + $0x58] sm:$0xff]  ;;  %v226_v42 = vld [vmem:[#allocation5 + $0x50] sm:$0xff]  ;;  %v4609_v61 = vsel %vm190_vm3, 1.0, %v4415_v26 }
  0x37   :  { %136 = vadd.xlane.f32.xlu0 %v135_v3  ;;  %3666 = vmatprep.subr.mxu0 %v4526_v6  ;;  %v225_v43 = vld [vmem:[#allocation5 + $0x48] sm:$0xff]  ;;  %v224_v44 = vld [vmem:[#allocation5 + $0x40] sm:$0xff]  ;;  %v223_v45 = vld [vmem:[#allocation5 + $0x38] sm:$0xff] }
  0x38   :  { %3667 = vmatpush3.msra.mxu0 %v4526_v6  ;;  %150 = vadd.xlane.f32.xlu1 %v149_v13  ;;  %v222_v46 = vld [vmem:[#allocation5 + $0x30] sm:$0xff]  ;;  %v221_v47 = vld [vmem:[#allocation5 + $0x28] sm:$0xff]  ;;  %v220_v48 = vld [vmem:[#allocation5 + $0x20] sm:$0xff] }
  0x39   :  { %3668 = vmatprep.subr.mxu0 %v4530_v7  ;;  %v219_v49 = vld [vmem:[#allocation5 + $0x18] sm:$0xff]  ;;  %v218_v50 = vld [vmem:[#allocation5 + $0x10] sm:$0xff]  ;;  %v217_v51 = vld [vmem:[#allocation5 + $0x8] sm:$0xff] }
  0x3a   :  { %3669 = vmatpush3.msra.mxu0 %v4530_v7  ;;  %v216_v52 = vld [vmem:[#allocation5] sm:$0xff]  ;;  %v236_v58 = vld [vmem:[#allocation7 + $0x18] sm:$0xff] }
  0x3b   :  { %3670 = vmatprep.subr.mxu0 %v4534_v8 }
  0x3c   :  { %3671 = vmatpush3.msra.mxu0 %v4534_v8 }
  0x3d   :  { %3672 = vmatprep.subr.mxu0 %v4538_v9 }
  0x3e   :  { %3673 = vmatpush3.msra.mxu0 %v4538_v9 }
  0x3f   :  { %3674 = vmatprep.subr.mxu0 %v4542_v10 }
  0x40   :  { %3675 = vmatpush3.msra.mxu0 %v4542_v10 }
  0x41   :  { %3676 = vmatprep.subr.mxu0 %v4547_v11 }
  0x42   :  { %3677 = vmatpush3.msra.mxu0 %v4547_v11 }
  0xbc   :  { %v134_v14 = vpop.xlane.xlu0 %133 }
  0xbd   :  { %v3281_v15 = vadd.f32 -1.0, %v134_v14 }
  0xbf   :  { %v140_v16 = vmax.f32 %v3281_v15, 0.0 }
  0xc0   :  { %v137_v17 = vpop.xlane.xlu0 %136 }
  0xc1   :  { %v142_v18 = vadd.f32 1.0, %v140_v16  ;;  %v3282_v19 = vadd.f32 -1.0, %v137_v17  ;;  %v151_v27 = vpop.xlane.xlu1 %150  ;;  %v111_v16 = vld [vmem:[%s5164_s3] sm:$0xff]  ;;  %v112_v17 = vld [vmem:[%s5164_s3 + $0x8] sm:$0xff] }
  0xc2   :  { %v3283_v28 = vadd.f32 -1.0, %v151_v27 }
  0xc3   :  { %4167 = vrcp.f32 %v142_v18  ;;  %v141_v20 = vmax.f32 %v3282_v19, 0.0  ;;  %v158_v18 = vsel %vm157_vm4, %v111_v16, 0.0  ;;  %v159_v19 = vsel %vm157_vm4, %v112_v17, 0.0 }
  0xc4   :  { %v153_v29 = vmax.f32 %v3283_v28, 0.0 }
  0xc5   :  { %v143_v21 = vadd.f32 1.0, %v141_v20  ;;  %v160_v20 = vadd.f32 %v159_v19, %v158_v18 }
  0xc6   :  { %v154_v30 = vadd.f32 1.0, %v153_v29 }
  0xc7   :  { %4169 = vrcp.f32 %v143_v21  ;;  %v161_v21 = vrot.slane %v160_v20, 4 }
  0xc8   :  { %4171 = vrcp.f32 %v154_v30 }
  0xd0   :  { %v4168_v22 = vpop.eup %4167 }
  0xd1   :  { %v4556_v23 = vmul.f32 %v4168_v22, %v100_v0  ;;  %v162_v22 = vadd.f32 %v161_v21, %v160_v20 }
  0xd3   :  { %3678 = vmatprep.mubr.msk.f32.mxu0 %vm131_vm0, %v4556_v23 }
  0xd4   :  { %v4170_v24 = vpop.eup %4169 }
  0xd5   :  { %v4560_v25 = vmul.f32 %v4170_v24, %v101_v1  ;;  %v4172_v31 = vpop.eup %4171  ;;  %v163_v24 = vrot.slane %v162_v22, 2 }
  0xd6   :  { %v4569_v33 = vmul.f32 %v4172_v31, %v102_v12 }
  0xd7   :  { %3679 = vmatmul.mubr.msk.f32.vlgmr.msra.gmra.mxu0 %vm131_vm0, %v4560_v25  ;;  %v164_v27 = vadd.f32 %v163_v24, %v162_v22 }
  0xd8   :  { %3735 = vmatprep.mubr.msk.f32.mxu0 %vm157_vm4, %v111_v16 }
  0xd9   :  { %v165_v28 = vrot.slane %v164_v27, 1 }
  0xdb   :  { %v166_v29 = vadd.f32 %v165_v28, %v164_v27 }
  0xdd   :  { %v3284_v30 = vadd.f32 -1.0, %v166_v29 }
  0xdf   :  { %v168_v31 = vmax.f32 %v3284_v30, 0.0 }
 0x197   :  { %v4567_v32 = vpop.f32.mrf.mxu0 }
 0x198   :  { %3682 = vmatpush3.msra.mxu1 %v4567_v32 }
 0x199   :  { %v4572_v34 = vpop.f32.mrf.mxu0  ;;  %3683 = vmatprep.subr.mxu1 %v4415_v26 }
 0x19a   :  { %3684 = vmatpush3.msra.mxu1 %v4572_v34 }
 0x19b   :  { %3686 = vmatmul.mubr.msk.f32.vlgmr.msra.gmra.mxu1 %vm148_vm1, %v4569_v33  ;;  %3688 = vmatprep.subr.mxu1 %v4415_v26 }
 0x19c   :  { %3690 = vmatprep.mubr.msk.f32.mxu1 %vm4416_vm2, %v4415_v26 }
 0x25b   :  { %v417_v35 = vpop.f32.mrf.mxu1 }
 0x25c   :  { %3689 = vmatpush3.xpose.msra.mxu1 %v417_v35 }
 0x25d   :  { %v3687_v36 = vpop.f32.mrf.mxu1  ;;  %3693 = vmatprep.subr.mxu1 %v4415_v26 }
 0x25f   :  { %3691 = vmatmul.mubr.f32.vlgmr.msra.gmra.mxu1 %v417_v35 }
 0x260   :  { %3694 = vmatpush3.msra.mxu1 %v231_v37  ;;  %3725 = vmatprep.mubr.msk.f32.mxu1 %vm4416_vm2, %v4415_v26 }
 0x261   :  { %3695 = vmatprep.subr.mxu1 %v4415_v26 }
 0x262   :  { %3696 = vmatpush3.msra.mxu1 %v230_v38 }
 0x263   :  { %3697 = vmatprep.subr.mxu1 %v4415_v26 }
 0x264   :  { %3698 = vmatpush3.msra.mxu1 %v229_v39 }
 0x265   :  { %3699 = vmatprep.subr.mxu1 %v4415_v26 }
 0x266   :  { %3700 = vmatpush3.msra.mxu1 %v228_v40 }
 0x267   :  { %3701 = vmatprep.subr.mxu1 %v4415_v26 }
 0x268   :  { %3702 = vmatpush3.msra.mxu1 %v227_v41  ;;  %v3294_v41 = vld [vmem:[%s5169_s8] ss:$0 sm:$0xff] }
 0x269   :  { %3703 = vmatprep.subr.mxu1 %v4415_v26 }
 0x26a   :  { %3704 = vmatpush3.msra.mxu1 %v226_v42 }
 0x26b   :  { %3705 = vmatprep.subr.mxu1 %v4415_v26 }
 0x26c   :  { %3706 = vmatpush3.msra.mxu1 %v225_v43 }
 0x26d   :  { %3707 = vmatprep.subr.mxu1 %v4415_v26 }
 0x26e   :  { %3708 = vmatpush3.msra.mxu1 %v224_v44 }
 0x26f   :  { %3709 = vmatprep.subr.mxu1 %v4415_v26 }
 0x270   :  { %3710 = vmatpush3.msra.mxu1 %v223_v45 }
 0x271   :  { %3711 = vmatprep.subr.mxu1 %v4415_v26 }
 0x272   :  { %3712 = vmatpush3.msra.mxu1 %v222_v46  ;;  %v248_v46 = vld [vmem:[#allocation7 + $0x78] sm:$0xff] }
 0x273   :  { %3713 = vmatprep.subr.mxu1 %v4415_v26 }
 0x274   :  { %3714 = vmatpush3.msra.mxu1 %v221_v47  ;;  %v247_v47 = vld [vmem:[#allocation7 + $0x70] sm:$0xff] }
 0x275   :  { %3715 = vmatprep.subr.mxu1 %v4415_v26 }
 0x276   :  { %3716 = vmatpush3.msra.mxu1 %v220_v48  ;;  %v246_v48 = vld [vmem:[#allocation7 + $0x68] sm:$0xff] }
 0x277   :  { %3717 = vmatprep.subr.mxu1 %v4415_v26 }
 0x278   :  { %3718 = vmatpush3.msra.mxu1 %v219_v49  ;;  %v245_v49 = vld [vmem:[#allocation7 + $0x60] sm:$0xff] }
 0x279   :  { %3719 = vmatprep.subr.mxu1 %v4415_v26 }
 0x27a   :  { %3720 = vmatpush3.msra.mxu1 %v218_v50  ;;  %v244_v50 = vld [vmem:[#allocation7 + $0x58] sm:$0xff] }
 0x27b   :  { %3721 = vmatprep.subr.mxu1 %v4415_v26 }
 0x27c   :  { %3722 = vmatpush3.msra.mxu1 %v217_v51  ;;  %v243_v51 = vld [vmem:[#allocation7 + $0x50] sm:$0xff] }
 0x27d   :  { %3723 = vmatprep.subr.mxu1 %v4415_v26 }
 0x27e   :  { %3724 = vmatpush3.msra.mxu1 %v216_v52  ;;  %v242_v52 = vld [vmem:[#allocation7 + $0x48] sm:$0xff] }
 0x27f   :  { %3726 = vmatmul.mubr.f32.vlgmr.msra.gmra.mxu1 %v417_v35  ;;  %3728 = vmatprep.subr.mxu1 %v4415_v26  ;;  %v169_v35 = vadd.f32 1.0, %v168_v31 }
 0x280   :  { %3730 = vmatprep.mubr.msk.f32.mxu1 %vm4416_vm2, %v4415_v26 }
 0x31f   :  { %v487_v53 = vpop.f32.mrf.mxu1 }
 0x320   :  { %v3292_v54 = vmul.f32 -1.442695, %v487_v53  ;;  %v241_v53 = vld [vmem:[#allocation7 + $0x40] sm:$0xff] }
 0x321   :  { %v3692_v55 = vpop.f32.mrf.mxu1 }
 0x322   :  { %4173 = vpow2.f32 %v3292_v54  ;;  %v240_v54 = vld [vmem:[#allocation7 + $0x38] sm:$0xff]  ;;  %v239_v55 = vld [vmem:[#allocation7 + $0x30] sm:$0xff] }
 0x32f   :  { %v4174_v56 = vpop.eup %4173 }
 0x330   :  { %v494_v57 = vadd.f32 1.0, %v4174_v56  ;;  %v238_v56 = vld [vmem:[#allocation7 + $0x28] sm:$0xff] }
 0x332   :  { %4175 = vrcp.f32 %v494_v57  ;;  %v237_v57 = vld [vmem:[#allocation7 + $0x20] sm:$0xff] }
 0x33f   :  { %v4176_v62 = vpop.eup %4175  ;;  %v570_v63 = vpop.f32.mrf.mxu1 }
 0x340   :  { %v497_v0 = vadd.f32 %v4176_v62, %v4609_v61  ;;  %v235_v62 = vld [vmem:[#allocation7 + $0x10] sm:$0xff] }
 0x341   :  { %v3727_v1 = vpop.f32.mrf.mxu1 }
 0x342   :  { %v498_v2 = vadd.f32 %v4609_v61, %v497_v0  ;;  %v233_v0 = vld [vmem:[#allocation7] sm:$0xff]  ;;  %v187_v1 = vadd.s32 8, %v4602_v59 }
 0x344   :  { %v499_v3 = vand.u32 2147483647, %v498_v2  ;;  %vm191_vm5 = vcmp.eq.s32.totalorder %v187_v1, %v4604_v60 }
 0x346   :  { %v500_v12 = vsel %vm157_vm4, %v499_v3, 0.0  ;;  %v196_v3 = vmul.f32 10000.0, %v4609_v61 }
 0x347   :  { %501 = vadd.xlane.f32.xlu1 %v500_v12 }
 0x3d0   :  { %v502_v13 = vpop.xlane.xlu1 %501 }
 0x3d1   :  { %4177 = vrsqrt.f32 %v502_v13  ;;  %v114_v13 = vld [vmem:[%s5165_s4 + $0x8] sm:$0xff] }
 0x3d2   :  { %4179 = vrcp.f32 %v169_v35 }
 0x3de   :  { %v4178_v14 = vpop.eup %4177 }
 0x3df   :  { %v574_v15 = vmul.f32 %v4178_v14, %v570_v63  ;;  %v4180_v36 = vpop.eup %4179  ;;  %v234_v63 = vld [vmem:[#allocation7 + $0x8] sm:$0xff] }
 0x3e0   :  { %v172_v37 = vmul.f32 %v4180_v36, %v112_v17  ;;  %v171_v38 = vmul.f32 %v4180_v36, %v111_v16 }
 0x3e1   :  { %3729 = vmatpush3.msra.mxu1 %v574_v15 }
 0x3e2   :  { %3731 = vmatmul.mubr.msk.f32.vlgmr.msra.gmra.mxu1 %vm157_vm4, %v498_v2  ;;  %v176_v39 = vsel %vm157_vm4, %v172_v37, 0.0  ;;  %v173_v40 = vsel %vm157_vm4, %v171_v38, 0.0  ;;  %v113_v2 = vld [vmem:[%s5165_s4] sm:$0xff] }
 0x3e3   :  { %177 = vadd.xlane.f32.xlu1 %v176_v39  ;;  %174 = vadd.xlane.f32.xlu0 %v173_v40  ;;  %v198_v12 = vsub.f32 %v113_v2, %v196_v3  ;;  %v104_v3 = vld [vmem:[%s5163_s2 + $0x8] sm:$0xff] }
 0x3e5   :  { %v200_v16 = vmax.f32 %v198_v12, 0.0  ;;  %v265_v12 = vld [vmem:[#allocation8 + $0x78] sm:$0xff] }
 0x3e7   :  { %v202_v59 = vadd.f32 %v4609_v61, %v200_v16  ;;  %v263_v16 = vld [vmem:[#allocation8 + $0x68] sm:$0xff] }
 0x3e9   :  { %v4642_v19 = vadd.f32 %v4609_v61, %v202_v59  ;;  %v262_v59 = vld [vmem:[#allocation8 + $0x60] sm:$0xff] }
 0x3eb   :  { %v206_v21 = vand.u32 2147483647, %v4642_v19  ;;  %3777 = vmatprep.mubr.msk.f32.mxu1 %vm148_vm1, %v4642_v19 }
 0x3ed   :  { %v208_v24 = vsel %vm148_vm1, %v206_v21, 0.0  ;;  %v109_v21 = vld [vmem:[%s5163_s2 + $0x30] sm:$0xff] }
 0x3ee   :  { %209 = vadd.xlane.f32.xlu1 %v208_v24  ;;  %v260_v24 = vld [vmem:[#allocation8 + $0x50] sm:$0xff] }
 0x46c   :  { %v178_v29 = vpop.xlane.xlu1 %177  ;;  %v175_v30 = vpop.xlane.xlu0 %174 }
 0x46d   :  { %v3286_v31 = vadd.f32 -1.0, %v178_v29  ;;  %v3285_v35 = vadd.f32 -1.0, %v175_v30  ;;  %v258_v29 = vld [vmem:[#allocation8 + $0x40] sm:$0xff]  ;;  %v257_v30 = vld [vmem:[#allocation8 + $0x38] sm:$0xff] }
 0x46f   :  { %v182_v36 = vmax.f32 %v3286_v31, 0.0  ;;  %v181_v37 = vmax.f32 %v3285_v35, 0.0  ;;  %v256_v31 = vld [vmem:[#allocation8 + $0x30] sm:$0xff]  ;;  %v255_v35 = vld [vmem:[#allocation8 + $0x28] sm:$0xff] }
 0x471   :  { %v184_v38 = vadd.f32 1.0, %v182_v36  ;;  %v183_v39 = vadd.f32 1.0, %v181_v37  ;;  %v254_v36 = vld [vmem:[#allocation8 + $0x20] sm:$0xff]  ;;  %v253_v37 = vld [vmem:[#allocation8 + $0x18] sm:$0xff] }
 0x473   :  { %4181 = vrcp.f32 %v184_v38  ;;  %v252_v38 = vld [vmem:[#allocation8 + $0x10] sm:$0xff] }
 0x474   :  { %4183 = vrcp.f32 %v183_v39  ;;  %v251_v39 = vld [vmem:[#allocation8 + $0x8] sm:$0xff] }
 0x480   :  { %v4652_v40 = vpop.eup %4181 }
 0x4a2   :  { %v644_v42 = vpop.f32.mrf.mxu1 }
 0x4a3   :  { %v648_v43 = vmul.f32 %v4178_v14, %v644_v42  ;;  %v3288_v14 = vsel %vm191_vm5, 1.0, %v4415_v26 }
 0x4a4   :  { %v3732_v44 = vpop.f32.mrf.mxu1  ;;  %v197_v15 = vmul.f32 10000.0, %v3288_v14 }
 0x4a5   :  { %v655_v45 = vadd.f32 %v3294_v41, %v648_v43  ;;  %v4654_v41 = vpop.eup %4183 }
 0x4a7   :  { %3733 = vmatprep.subr.mxu0 %v655_v45 }
 0x4a8   :  { %3734 = vmatpush3.msra.mxu0 %v655_v45 }
 0x4a9   :  { %3736 = vmatmul.mubr.msk.f32.vlgmr.msra.gmra.mxu0 %vm157_vm4, %v112_v17  ;;  %3738 = vmatprep.subr.mxu0 %v248_v46  ;;  %v199_v17 = vsub.f32 %v114_v13, %v197_v15  ;;  %v105_v13 = vld [vmem:[%s5163_s2 + $0x10] sm:$0xff]  ;;  %v106_v15 = vld [vmem:[%s5163_s2 + $0x18] sm:$0xff] }
 0x4aa   :  { %3739 = vmatpush3.msra.mxu0 %v248_v46 }
 0x4ab   :  { %3740 = vmatprep.subr.mxu0 %v247_v47  ;;  %v201_v18 = vmax.f32 %v199_v17, 0.0  ;;  %v107_v17 = vld [vmem:[%s5163_s2 + $0x20] sm:$0xff] }
 0x4ac   :  { %3741 = vmatpush3.msra.mxu0 %v247_v47 }
 0x4ad   :  { %3742 = vmatprep.subr.mxu0 %v246_v48  ;;  %v203_v20 = vadd.f32 %v3288_v14, %v201_v18  ;;  %v108_v18 = vld [vmem:[%s5163_s2 + $0x28] sm:$0xff] }
 0x4ae   :  { %3743 = vmatpush3.msra.mxu0 %v246_v48 }
 0x4af   :  { %3744 = vmatprep.subr.mxu0 %v245_v49  ;;  %v4647_v22 = vadd.f32 %v3288_v14, %v203_v20  ;;  %v264_v14 = vld [vmem:[#allocation8 + $0x70] sm:$0xff]  ;;  %v261_v20 = vld [vmem:[#allocation8 + $0x58] sm:$0xff] }
 0x4b0   :  { %3745 = vmatpush3.msra.mxu0 %v245_v49 }
 0x4b1   :  { %3746 = vmatprep.subr.mxu0 %v244_v50  ;;  %v207_v27 = vand.u32 2147483647, %v4647_v22 }
 0x4b2   :  { %3747 = vmatpush3.msra.mxu0 %v244_v50 }
 0x4b3   :  { %3748 = vmatprep.subr.mxu0 %v243_v51  ;;  %v211_v28 = vsel %vm148_vm1, %v207_v27, 0.0  ;;  %v110_v27 = vld [vmem:[%s5163_s2 + $0x38] sm:$0xff] }
 0x4b4   :  { %3749 = vmatpush3.msra.mxu0 %v243_v51  ;;  %212 = vadd.xlane.f32.xlu0 %v211_v28  ;;  %v210_v51 = vpop.xlane.xlu1 %209  ;;  %v259_v28 = vld [vmem:[#allocation8 + $0x48] sm:$0xff] }
 0x4b5   :  { %3750 = vmatprep.subr.mxu0 %v242_v52 }
 0x4b6   :  { %3751 = vmatpush3.msra.mxu0 %v242_v52 }
 0x4b7   :  { %3752 = vmatprep.subr.mxu0 %v241_v53 }
 0x4b8   :  { %3753 = vmatpush3.msra.mxu0 %v241_v53 }
 0x4b9   :  { %3754 = vmatprep.subr.mxu0 %v240_v54 }
 0x4ba   :  { %3755 = vmatpush3.msra.mxu0 %v240_v54 }
 0x4bb   :  { %3756 = vmatprep.subr.mxu0 %v239_v55 }
 0x4bc   :  { %3757 = vmatpush3.msra.mxu0 %v239_v55 }
 0x4bd   :  { %3758 = vmatprep.subr.mxu0 %v238_v56 }
 0x4be   :  { %3759 = vmatpush3.msra.mxu0 %v238_v56 }
 0x4bf   :  { %3760 = vmatprep.subr.mxu0 %v237_v57 }
 0x4c0   :  { %3761 = vmatpush3.msra.mxu0 %v237_v57 }
 0x4c1   :  { %3762 = vmatprep.subr.mxu0 %v236_v58 }
 0x4c2   :  { %3763 = vmatpush3.msra.mxu0 %v236_v58 }
 0x4c3   :  { %3764 = vmatprep.subr.mxu0 %v235_v62 }
 0x4c4   :  { %3765 = vmatpush3.msra.mxu0 %v235_v62 }
 0x4c5   :  { %3766 = vmatprep.subr.mxu0 %v234_v63 }
 0x4c6   :  { %3767 = vmatpush3.msra.mxu0 %v234_v63 }
 0x4c7   :  { %3768 = vmatprep.subr.mxu0 %v233_v0 }
 0x4c8   :  { %3769 = vmatpush3.msra.mxu0 %v233_v0 }
 0x53d   :  { %v213_v50 = vpop.xlane.xlu0 %212 }
 0x53e   :  { %4185 = vrsqrt.f32 %v213_v50 }
 0x53f   :  { %4187 = vrsqrt.f32 %v210_v51 }
 0x54b   :  { %v4660_v52 = vpop.eup %4185 }
 0x54c   :  { %v4662_v53 = vpop.eup %4187 }
 0x569   :  { %v3737_v42 = vpop.f32.mrf.mxu0 }
 0x56a   :  { %v740_v43 = vmul.f32 %v4652_v40, %v3737_v42  ;;  %v250_v42 = vld [vmem:[#allocation8] sm:$0xff] }
 0x56b   :  { %v728_v44 = vpop.f32.mrf.mxu0 }
 0x56c   :  { %v738_v45 = vmul.f32 %v4654_v41, %v728_v44  ;;  %v742_v46 = vmul.f32 0.15, %v740_v43 }
 0x56e   :  { %v741_v47 = vmul.f32 0.15, %v738_v45  ;;  %v744_v49 = vadd.f32 %v4567_v32, %v742_v46  ;;  %v103_v32 = vld [vmem:[%s5163_s2] sm:$0xff] }
 0x570   :  { %v743_v48 = vadd.f32 %v741_v47, %v4572_v34  ;;  %v3299_v34 = vld [vmem:[%s5171_s10] ss:$0 sm:$0xff] }
 0x572   :  { %3770 = vmatprep.mubr.f32.mxu0 %v743_v48 }
 0x573   :  { %3771 = vmatmul.mubr.f32.vlgmr.msra.gmra.mxu0 %v744_v49 }
 0x633   :  { %v3772_v54 = vpop.f32.mrf.mxu0 }
 0x634   :  { %v821_v55 = vmul.f32 %v4660_v52, %v3772_v54 }
 0x635   :  { %v811_v56 = vpop.f32.mrf.mxu0 }
 0x636   :  { %v820_v57 = vmul.f32 %v4662_v53, %v811_v56  ;;  %3773 = vmatprep.subr.mxu1 %v821_v55 }
 0x637   :  { %3774 = vmatpush3.msra.mxu1 %v821_v55 }
 0x638   :  { %3775 = vmatprep.subr.mxu1 %v820_v57 }
 0x639   :  { %3776 = vmatpush3.msra.mxu1 %v820_v57 }
 0x63a   :  { %3778 = vmatmul.mubr.msk.f32.vlgmr.msra.gmra.mxu1 %vm148_vm1, %v4647_v22 }
 0x63b   :  { %3784 = vmatprep.mubr.msk.f32.mxu1 %vm148_vm1, %v103_v32 }
 0x6fa   :  { %v3779_v58 = vpop.f32.mrf.mxu1 }
 0x6fb   :  { %v904_v62 = vmul.f32 %v4660_v52, %v3779_v58 }
 0x6fc   :  { %v894_v63 = vpop.f32.mrf.mxu1 }
 0x6fd   :  { %v912_v0 = vadd.f32 %v3299_v34, %v904_v62  ;;  %v903_v1 = vmul.f32 %v4662_v53, %v894_v63 }
 0x6ff   :  { %v911_v2 = vadd.f32 %v3299_v34, %v903_v1  ;;  %3780 = vmatprep.subr.mxu1 %v912_v0 }
 0x700   :  { %3781 = vmatpush3.msra.mxu1 %v912_v0 }
 0x701   :  { %3782 = vmatprep.subr.mxu1 %v911_v2 }
 0x702   :  { %3783 = vmatpush3.msra.mxu1 %v911_v2 }
 0x703   :  { %3785 = vmatmul.mubr.msk.f32.vlgmr.msra.gmra.mxu1 %vm148_vm1, %v104_v3  ;;  %3796 = vmatprep.subr.mxu1 %v265_v12 }
 0x704   :  { %3787 = vmatprep.mubr.msk.f32.mxu1 %vm148_vm1, %v105_v13  ;;  %3797 = vmatpush3.msra.mxu1 %v265_v12 }
 0x705   :  { %3798 = vmatprep.subr.mxu1 %v264_v14 }
 0x706   :  { %3799 = vmatpush3.msra.mxu1 %v264_v14 }
 0x707   :  { %3788 = vmatmul.mubr.msk.f32.gmra.mxu1 %vm148_vm1, %v106_v15  ;;  %3800 = vmatprep.subr.mxu1 %v263_v16 }
 0x708   :  { %3790 = vmatprep.mubr.msk.f32.mxu1 %vm148_vm1, %v107_v17  ;;  %3801 = vmatpush3.msra.mxu1 %v263_v16 }
 0x709   :  { %3802 = vmatprep.subr.mxu1 %v262_v59 }
 0x70a   :  { %3803 = vmatpush3.msra.mxu1 %v262_v59 }
 0x70b   :  { %3791 = vmatmul.mubr.msk.f32.gmra.mxu1 %vm148_vm1, %v108_v18  ;;  %3804 = vmatprep.subr.mxu1 %v261_v20 }
 0x70c   :  { %3793 = vmatprep.mubr.msk.f32.mxu1 %vm148_vm1, %v109_v21  ;;  %3805 = vmatpush3.msra.mxu1 %v261_v20 }
 0x70d   :  { %3806 = vmatprep.subr.mxu1 %v260_v24 }
 0x70e   :  { %3807 = vmatpush3.msra.mxu1 %v260_v24 }
 0x70f   :  { %3794 = vmatmul.mubr.msk.f32.gmra.mxu1 %vm148_vm1, %v110_v27  ;;  %3808 = vmatprep.subr.mxu1 %v259_v28 }
 0x710   :  { %3809 = vmatpush3.msra.mxu1 %v259_v28 }
 0x711   :  { %3810 = vmatprep.subr.mxu1 %v258_v29 }
 0x712   :  { %3811 = vmatpush3.msra.mxu1 %v258_v29 }
 0x713   :  { %3812 = vmatprep.subr.mxu1 %v257_v30 }
 0x714   :  { %3813 = vmatpush3.msra.mxu1 %v257_v30 }
 0x715   :  { %3814 = vmatprep.subr.mxu1 %v256_v31 }
 0x716   :  { %3815 = vmatpush3.msra.mxu1 %v256_v31 }
 0x717   :  { %3816 = vmatprep.subr.mxu1 %v255_v35 }
 0x718   :  { %3817 = vmatpush3.msra.mxu1 %v255_v35 }
 0x719   :  { %3818 = vmatprep.subr.mxu1 %v254_v36 }
 0x71a   :  { %3819 = vmatpush3.msra.mxu1 %v254_v36 }
 0x71b   :  { %3820 = vmatprep.subr.mxu1 %v253_v37 }
 0x71c   :  { %3821 = vmatpush3.msra.mxu1 %v253_v37 }
 0x71d   :  { %3822 = vmatprep.subr.mxu1 %v252_v38 }
 0x71e   :  { %3823 = vmatpush3.msra.mxu1 %v252_v38 }
 0x71f   :  { %3824 = vmatprep.subr.mxu1 %v251_v39 }
 0x720   :  { %3825 = vmatpush3.msra.mxu1 %v251_v39 }
 0x721   :  { %3826 = vmatprep.subr.mxu1 %v250_v42 }
 0x722   :  { %3827 = vmatpush3.msra.mxu1 %v250_v42 }
 0x7c3   :  { %v3786_v43 = vpop.f32.mrf.mxu1 }
 0x7c4   :  { %v1043_v44 = vmul.f32 0.5, %v3786_v43 }
 0x7c5   :  { %v1003_v45 = vpop.f32.mrf.mxu1 }
 0x7c6   :  { %v1042_v46 = vmul.f32 0.5, %v1003_v45  ;;  %v1051_v49 = vadd.f32 %v1043_v44, %v4542_v10 }
 0x7c7   :  { %v3789_v47 = vpop.f32.mrf.mxu1 }
 0x7c8   :  { %v1050_v48 = vadd.f32 %v1042_v46, %v4547_v11  ;;  %v1045_v50 = vmul.f32 0.5, %v3789_v47 }
 0x7c9   :  { %v1013_v51 = vpop.f32.mrf.mxu1 }
 0x7ca   :  { %v1044_v54 = vmul.f32 0.5, %v1013_v51  ;;  %3828 = vmatprep.mubr.f32.mxu1 %v1050_v48  ;;  %v1053_v57 = vadd.f32 %v1045_v50, %v4534_v8  ;;  %v266_v8 = vld [vmem:[%s5173_s12] sm:$0x3]  ;;  %v4780_v48 = vld [vmem:[%s5166_s5 + $0x8] sm:$0xff] }
 0x7cb   :  { %v3792_v55 = vpop.f32.mrf.mxu1  ;;  %3829 = vmatmul.mubr.f32.vlgmr.msra.gmra.mxu1 %v1051_v49  ;;  %3840 = vmatprep.subr.mxu0 %v266_v8  ;;  %v4785_v50 = vld [vmem:[%s5166_s5] sm:$0xff]  ;;  %vm1465_vm10 = vcmp.gt.f32.partialorder %v4780_v48, 0.0 }
 0x7cc   :  { %v1052_v56 = vadd.f32 %v1044_v54, %v4538_v9  ;;  %v1047_v32 = vmul.f32 0.5, %v3792_v55  ;;  %3841 = vmatpush3.xpose.msra.mxu0 %v266_v8  ;;  %v4791_v54 = vld [vmem:[%s5166_s5 + $0x18] sm:$0xff]  ;;  %vm1464_vm12 = vcmp.gt.f32.partialorder %v4785_v50, 0.0  ;;  %v4815_v8 = vld [vmem:[%s5166_s5 + $0x20] sm:$0xff] }
 0x7cd   :  { %v1023_v34 = vpop.f32.mrf.mxu1  ;;  %vm1467_vm13 = vcmp.gt.f32.partialorder %v4791_v54, 0.0 }
 0x7ce   :  { %v1046_v58 = vmul.f32 0.5, %v1023_v34  ;;  %3831 = vmatprep.mubr.f32.mxu1 %v1052_v56  ;;  %v1055_v10 = vadd.f32 %v1047_v32, %v4526_v6 }
 0x7cf   :  { %v3795_v62 = vpop.f32.mrf.mxu1  ;;  %3832 = vmatmul.mubr.f32.gmra.mxu1 %v1053_v57  ;;  %v4797_v57 = vld [vmem:[%s5166_s5 + $0x10] sm:$0xff] }
 0x7d0   :  { %v1054_v11 = vadd.f32 %v1046_v58, %v4530_v7  ;;  %v1049_v63 = vmul.f32 0.5, %v3795_v62  ;;  %vm1466_vm15 = vcmp.gt.f32.partialorder %v4797_v57, 0.0 }
 0x7d1   :  { %v1033_v0 = vpop.f32.mrf.mxu1 }
 0x7d2   :  { %v1048_v1 = vmul.f32 0.5, %v1033_v0  ;;  %3834 = vmatprep.mubr.f32.mxu1 %v1054_v11  ;;  %v1057_v9 = vadd.f32 %v1049_v63, %v4520_v4 }
 0x7d3   :  { %3835 = vmatmul.mubr.f32.gmra.mxu1 %v1055_v10  ;;  %v4806_v10 = vld [vmem:[%s5166_s5 + $0x28] sm:$0xff] }
 0x7d4   :  { %v1056_v2 = vadd.f32 %v1048_v1, %v4523_v5  ;;  %vm5180_vm5 = vcmp.gt.f32.partialorder %v4806_v10, 0.0 }
 0x7d6   :  { %3837 = vmatprep.mubr.f32.mxu1 %v1056_v2 }
 0x7d7   :  { %3838 = vmatmul.mubr.f32.gmra.mxu1 %v1057_v9 }
 0x88b   :  { %v3830_v7 = vpop.f32.mrf.mxu1 }
 0x88d   :  { %v1124_v3 = vpop.f32.mrf.mxu1 }
 0x88e   :  { %3842 = vmatprep.mubr.f32.mxu0 %v1124_v3 }
 0x88f   :  { %v3833_v6 = vpop.f32.mrf.mxu1  ;;  %3843 = vmatmul.mubr.f32.vlgmr.msra.gmra.mxu0 %v3830_v7 }
 0x891   :  { %v1134_v12 = vpop.f32.mrf.mxu1 }
 0x892   :  { %3845 = vmatprep.mubr.f32.mxu0 %v1134_v12 }
 0x893   :  { %v3836_v13 = vpop.f32.mrf.mxu1  ;;  %3846 = vmatmul.mubr.f32.gmra.mxu0 %v3833_v6 }
 0x895   :  { %v1144_v5 = vpop.f32.mrf.mxu1 }
 0x896   :  { %3848 = vmatprep.mubr.f32.mxu0 %v1144_v5 }
 0x897   :  { %v3839_v4 = vpop.f32.mrf.mxu1  ;;  %3849 = vmatmul.mubr.f32.gmra.mxu0 %v3836_v13 }
 0x898   :  { %3882 = vmatprep.subr.mxu1 %v3839_v4 }
 0x899   :  { %v1154_v14 = vpop.f32.mrf.mxu1  ;;  %3883 = vmatpush3.msra.mxu1 %v3839_v4 }
 0x89a   :  { %3851 = vmatprep.mubr.f32.mxu0 %v1154_v14  ;;  %3884 = vmatprep.subr.mxu1 %v1154_v14 }
 0x89b   :  { %3852 = vmatmul.mubr.f32.gmra.mxu0 %v3839_v4  ;;  %3885 = vmatpush3.msra.mxu1 %v1154_v14 }
 0x89c   :  { %3886 = vmatprep.subr.mxu1 %v3836_v13 }
 0x89d   :  { %3887 = vmatpush3.msra.mxu1 %v3836_v13 }
 0x89e   :  { %3888 = vmatprep.subr.mxu1 %v1144_v5 }
 0x89f   :  { %3889 = vmatpush3.msra.mxu1 %v1144_v5  ;;  %v4824_v5 = vld [vmem:[%s5166_s5 + $0x38] sm:$0xff] }
 0x8a0   :  { %3890 = vmatprep.subr.mxu1 %v3833_v6 }
 0x8a1   :  { %3891 = vmatpush3.msra.mxu1 %v3833_v6 }
 0x8a2   :  { %3892 = vmatprep.subr.mxu1 %v1134_v12 }
 0x8a3   :  { %3893 = vmatpush3.msra.mxu1 %v1134_v12 }
 0x8a4   :  { %3894 = vmatprep.subr.mxu1 %v3830_v7 }
 0x8a5   :  { %3895 = vmatpush3.msra.mxu1 %v3830_v7 }
 0x8a6   :  { %3896 = vmatprep.subr.mxu1 %v1124_v3 }
 0x8a7   :  { %3897 = vmatpush3.msra.mxu1 %v1124_v3 }
 0x8a8   :  { %3936 = vmatprep.subr.mxu1 %v4415_v26 }
 0x94f   :  { %v3844_v15 = vpop.f32.mrf.mxu0 }
 0x950   :  { %v1279_v37 = vsel %vm5175_vm8, %v3844_v15, 1.0  ;;  %v1270_v39 = vsel %vm1268_vm7, %v3844_v15, 1.0 }
 0x951   :  { %v1229_v16 = vpop.f32.mrf.mxu0 }
 0x952   :  { %v1269_v17 = vsel %vm1268_vm7, %v1229_v16, 1.0  ;;  %v1278_v38 = vsel %vm5175_vm8, %v1229_v16, 1.0 }
 0x953   :  { %v3847_v59 = vpop.f32.mrf.mxu0  ;;  %3870 = vmatprep.mubr.msk.f32.mxu0 %vm5176_vm6, %v1269_v17 }
 0x954   :  { %v1281_v35 = vsel %vm5175_vm8, %v3847_v59, 1.0  ;;  %v1272_v43 = vsel %vm1268_vm7, %v3847_v59, 1.0  ;;  %v4833_v59 = vld [vmem:[%s5166_s5 + $0x30] sm:$0xff] }
 0x955   :  { %v1239_v18 = vpop.f32.mrf.mxu0 }
 0x956   :  { %v1280_v36 = vsel %vm5175_vm8, %v1239_v18, 1.0  ;;  %v1271_v42 = vsel %vm1268_vm7, %v1239_v18, 1.0 }
 0x957   :  { %v3850_v20 = vpop.f32.mrf.mxu0 }
 0x958   :  { %v1283_v30 = vsel %vm5175_vm8, %v3850_v20, 1.0  ;;  %v1274_v45 = vsel %vm1268_vm7, %v3850_v20, 1.0 }
 0x959   :  { %v1249_v21 = vpop.f32.mrf.mxu0 }
 0x95a   :  { %v1282_v31 = vsel %vm5175_vm8, %v1249_v21, 1.0  ;;  %v1273_v44 = vsel %vm1268_vm7, %v1249_v21, 1.0 }
 0x95b   :  { %v3853_v24 = vpop.f32.mrf.mxu0 }
 0x95c   :  { %v1285_v27 = vsel %vm5175_vm8, %v3853_v24, 1.0  ;;  %v1276_v47 = vsel %vm1268_vm7, %v3853_v24, 1.0 }
 0x95d   :  { %v1259_v28 = vpop.f32.mrf.mxu0  ;;  %3854 = vmatprep.subr.msk.mxu0 %vm5176_vm6, %v1285_v27 }
 0x95e   :  { %v1284_v29 = vsel %vm5175_vm8, %v1259_v28, 1.0  ;;  %3855 = vmatpush3.xpose.msk.msra.mxu0 %vm5176_vm6, %v1285_v27  ;;  %v1275_v46 = vsel %vm1268_vm7, %v1259_v28, 1.0 }
 0x95f   :  { %3856 = vmatprep.subr.msk.mxu0 %vm5176_vm6, %v1284_v29 }
 0x962   :  { %3857 = vmatpush3.xpose.msk.msra.mxu0 %vm5176_vm6, %v1284_v29 }
 0x963   :  { %3858 = vmatprep.subr.msk.mxu0 %vm5176_vm6, %v1283_v30 }
 0x966   :  { %3859 = vmatpush3.xpose.msk.msra.mxu0 %vm5176_vm6, %v1283_v30 }
 0x967   :  { %3860 = vmatprep.subr.msk.mxu0 %vm5176_vm6, %v1282_v31 }
 0x96a   :  { %3861 = vmatpush3.xpose.msk.msra.mxu0 %vm5176_vm6, %v1282_v31 }
 0x96b   :  { %3862 = vmatprep.subr.msk.mxu0 %vm5176_vm6, %v1281_v35 }
 0x96e   :  { %3863 = vmatpush3.xpose.msk.msra.mxu0 %vm5176_vm6, %v1281_v35 }
 0x96f   :  { %3864 = vmatprep.subr.msk.mxu0 %vm5176_vm6, %v1280_v36 }
 0x972   :  { %3865 = vmatpush3.xpose.msk.msra.mxu0 %vm5176_vm6, %v1280_v36 }
 0x973   :  { %3866 = vmatprep.subr.msk.mxu0 %vm5176_vm6, %v1279_v37 }
 0x976   :  { %3867 = vmatpush3.xpose.msk.msra.mxu0 %vm5176_vm6, %v1279_v37 }
 0x977   :  { %3868 = vmatprep.subr.msk.mxu0 %vm5176_vm6, %v1278_v38 }
 0x97a   :  { %3869 = vmatpush3.xpose.msk.msra.mxu0 %vm5176_vm6, %v1278_v38 }
 0x97d   :  { %3871 = vmatmul.mubr.msk.f32.vlgmr.msra.gmra.mxu0 %vm5176_vm6, %v1270_v39 }
 0x97e   :  { %3873 = vmatprep.mubr.msk.f32.mxu0 %vm5176_vm6, %v1271_v42 }
 0x981   :  { %3874 = vmatmul.mubr.msk.f32.gmra.mxu0 %vm5176_vm6, %v1272_v43 }
 0x982   :  { %3876 = vmatprep.mubr.msk.f32.mxu0 %vm5176_vm6, %v1273_v44 }
 0x985   :  { %3877 = vmatmul.mubr.msk.f32.gmra.mxu0 %vm5176_vm6, %v1274_v45 }
 0x986   :  { %3879 = vmatprep.mubr.msk.f32.mxu0 %vm5176_vm6, %v1275_v46 }
 0x989   :  { %3880 = vmatmul.mubr.msk.f32.gmra.mxu0 %vm5176_vm6, %v1276_v47 }
 0x98a   :  { %3926 = vmatprep.mubr.msk.f32.mxu0 %vm131_vm0, %v4556_v23 }
 0xa3d   :  { %v3872_v49 = vpop.f32.mrf.mxu0 }
 0xa3e   :  { %vm1441_vm9 = vcmp.gt.f32.partialorder %v3872_v49, 0.0  ;;  %v1449_v51 = vmul.f32 0.2, %v3872_v49 }
 0xa3f   :  { %v1401_v23 = vpop.f32.mrf.mxu0 }
 0xa40   :  { %vm1440_vm11 = vcmp.gt.f32.partialorder %v1401_v23, 0.0  ;;  %v1448_v55 = vmul.f32 0.2, %v1401_v23  ;;  %v1457_v56 = vsel %vm1441_vm9, %v3872_v49, %v1449_v51 }
 0xa41   :  { %v3875_v32 = vpop.f32.mrf.mxu0  ;;  %v1473_v34 = vsel %vm1465_vm10, %v1457_v56, -1e+30 }
 0xa42   :  { %vm1443_vm14 = vcmp.gt.f32.partialorder %v3875_v32, 0.0  ;;  %v1451_v58 = vmul.f32 0.2, %v3875_v32  ;;  %v1483_v62 = vsel %vm131_vm0, %v1473_v34, -inf  ;;  %v1456_v11 = vsel %vm1440_vm11, %v1401_v23, %v1448_v55 }
 0xa43   :  { %1484 = vmax.xlane.f32.xlu1 %v1483_v62  ;;  %v1411_v63 = vpop.f32.mrf.mxu0  ;;  %v1472_v0 = vsel %vm1464_vm12, %v1456_v11, -1e+30  ;;  %vm5179_vm11 = vcmp.gt.f32.partialorder %v4815_v8, 0.0 }
 0xa44   :  { %vm1442_vm3 = vcmp.gt.f32.partialorder %v1411_v63, 0.0  ;;  %v1450_v1 = vmul.f32 0.2, %v1411_v63  ;;  %v1480_v2 = vsel %vm131_vm0, %v1472_v0, -inf  ;;  %v1459_v9 = vsel %vm1443_vm14, %v3875_v32, %v1451_v58 }
 0xa45   :  { %1481 = vmax.xlane.f32.xlu0 %v1480_v2  ;;  %v3878_v7 = vpop.f32.mrf.mxu0  ;;  %v1475_v3 = vsel %vm1467_vm13, %v1459_v9, -1e+30 }
 0xa46   :  { %vm1445_vm9 = vcmp.gt.f32.partialorder %v3878_v7, 0.0  ;;  %v1453_v6 = vmul.f32 0.2, %v3878_v7  ;;  %v1489_v12 = vsel %vm131_vm0, %v1475_v3, -inf  ;;  %v1458_v13 = vsel %vm1442_vm3, %v1411_v63, %v1450_v1 }
 0xa47   :  { %1490 = vmax.xlane.f32.xlu1 %v1489_v12  ;;  %v1421_v4 = vpop.f32.mrf.mxu0  ;;  %v1474_v14 = vsel %vm1466_vm15, %v1458_v13, -1e+30  ;;  %vm5178_vm3 = vcmp.gt.f32.partialorder %v4824_v5, 0.0 }
 0xa48   :  { %vm1444_vm14 = vcmp.gt.f32.partialorder %v1421_v4, 0.0  ;;  %v1452_v15 = vmul.f32 0.2, %v1421_v4  ;;  %v1486_v16 = vsel %vm131_vm0, %v1474_v14, -inf  ;;  %v1461_v17 = vsel %vm1445_vm9, %v3878_v7, %v1453_v6 }
 0xa49   :  { %1487 = vmax.xlane.f32.xlu0 %v1486_v16  ;;  %v3881_v18 = vpop.f32.mrf.mxu0  ;;  %v1477_v20 = vsel %vm5180_vm5, %v1461_v17, -1e+30  ;;  %vm5177_vm9 = vcmp.gt.f32.partialorder %v4833_v59, 0.0 }
 0xa4a   :  { %vm1447_vm8 = vcmp.gt.f32.partialorder %v3881_v18, 0.0  ;;  %v1455_v21 = vmul.f32 0.2, %v3881_v18  ;;  %v1495_v24 = vsel %vm131_vm0, %v1477_v20, -inf  ;;  %v1460_v27 = vsel %vm1444_vm14, %v1421_v4, %v1452_v15 }
 0xa4b   :  { %1496 = vmax.xlane.f32.xlu1 %v1495_v24  ;;  %v1431_v28 = vpop.f32.mrf.mxu0  ;;  %v1476_v29 = vsel %vm5179_vm11, %v1460_v27, -1e+30 }
 0xa4c   :  { %vm1446_vm6 = vcmp.gt.f32.partialorder %v1431_v28, 0.0  ;;  %v1454_v30 = vmul.f32 0.2, %v1431_v28  ;;  %v1492_v31 = vsel %vm131_vm0, %v1476_v29, -inf  ;;  %v1463_v35 = vsel %vm1447_vm8, %v3881_v18, %v1455_v21 }
 0xa4d   :  { %1493 = vmax.xlane.f32.xlu0 %v1492_v31  ;;  %v1479_v36 = vsel %vm5178_vm3, %v1463_v35, -1e+30 }
 0xa4e   :  { %v1501_v37 = vsel %vm131_vm0, %v1479_v36, -inf  ;;  %v1462_v38 = vsel %vm1446_vm6, %v1431_v28, %v1454_v30 }
 0xa4f   :  { %1502 = vmax.xlane.f32.xlu1 %v1501_v37  ;;  %v1478_v39 = vsel %vm5177_vm9, %v1462_v38, -1e+30 }
 0xa50   :  { %v1498_v42 = vsel %vm131_vm0, %v1478_v39, -inf }
 0xa51   :  { %1499 = vmax.xlane.f32.xlu0 %v1498_v42 }
 0xacc   :  { %v1485_v43 = vpop.xlane.xlu1 %1484 }
 0xacd   :  { %v1505_v44 = vsub.f32 %v1473_v34, %v1485_v43 }
 0xace   :  { %v1482_v45 = vpop.xlane.xlu0 %1481 }
 0xacf   :  { %v1514_v46 = vmul.f32 1.442695, %v1505_v44  ;;  %v1504_v47 = vsub.f32 %v1472_v0, %v1482_v45 }
 0xad0   :  { %v1491_v49 = vpop.xlane.xlu1 %1490 }
 0xad1   :  { %v1512_v51 = vmul.f32 1.442695, %v1504_v47  ;;  %v1507_v23 = vsub.f32 %v1475_v3, %v1491_v49  ;;  %4189 = vpow2.f32 %v1514_v46 }
 0xad2   :  { %v1488_v55 = vpop.xlane.xlu0 %1487 }
 0xad3   :  { %4191 = vpow2.f32 %v1512_v51  ;;  %v1518_v56 = vmul.f32 1.442695, %v1507_v23  ;;  %v1506_v32 = vsub.f32 %v1474_v14, %v1488_v55 }
 0xad4   :  { %v1497_v58 = vpop.xlane.xlu1 %1496 }
 0xad5   :  { %v1516_v62 = vmul.f32 1.442695, %v1506_v32  ;;  %v1509_v11 = vsub.f32 %v1477_v20, %v1497_v58  ;;  %4193 = vpow2.f32 %v1518_v56 }
 0xad6   :  { %v1494_v63 = vpop.xlane.xlu0 %1493 }
 0xad7   :  { %4195 = vpow2.f32 %v1516_v62  ;;  %v1522_v1 = vmul.f32 1.442695, %v1509_v11  ;;  %v1508_v2 = vsub.f32 %v1476_v29, %v1494_v63 }
 0xad8   :  { %v1503_v34 = vpop.xlane.xlu1 %1502 }
 0xad9   :  { %v1520_v9 = vmul.f32 1.442695, %v1508_v2  ;;  %v1511_v7 = vsub.f32 %v1479_v36, %v1503_v34  ;;  %4197 = vpow2.f32 %v1522_v1 }
 0xada   :  { %v1500_v0 = vpop.xlane.xlu0 %1499 }
 0xadb   :  { %4199 = vpow2.f32 %v1520_v9  ;;  %v1526_v3 = vmul.f32 1.442695, %v1511_v7  ;;  %v1510_v6 = vsub.f32 %v1478_v39, %v1500_v0 }
 0xadd   :  { %4201 = vpow2.f32 %v1526_v3  ;;  %v1524_v12 = vmul.f32 1.442695, %v1510_v6 }
 0xade   :  { %v4190_v13 = vpop.eup %4189 }
 0xadf   :  { %4203 = vpow2.f32 %v1524_v12  ;;  %v1529_v15 = vsel %vm1465_vm10, %v4190_v13, 0.0 }
 0xae0   :  { %v4192_v4 = vpop.eup %4191  ;;  %v1539_v44 = vsel %vm131_vm0, %v1529_v15, 0.0 }
 0xae1   :  { %v1528_v14 = vsel %vm1464_vm12, %v4192_v4, 0.0 }
 0xae2   :  { %3898 = vmatprep.mubr.msk.f32.mxu1 %vm131_vm0, %v1528_v14  ;;  %v4194_v16 = vpop.eup %4193  ;;  %v1536_v45 = vsel %vm131_vm0, %v1528_v14, 0.0 }
 0xae3   :  { %3899 = vmatmul.mubr.msk.f32.vlgmr.msra.gmra.mxu1 %vm131_vm0, %v1529_v15  ;;  %v1531_v20 = vsel %vm1467_vm13, %v4194_v16, 0.0 }
 0xae4   :  { %v4196_v17 = vpop.eup %4195  ;;  %v1545_v42 = vsel %vm131_vm0, %v1531_v20, 0.0 }
 0xae5   :  { %v1530_v18 = vsel %vm1466_vm15, %v4196_v17, 0.0 }
 0xae6   :  { %3901 = vmatprep.mubr.msk.f32.mxu1 %vm131_vm0, %v1530_v18  ;;  %v4198_v21 = vpop.eup %4197  ;;  %v1542_v43 = vsel %vm131_vm0, %v1530_v18, 0.0 }
 0xae7   :  { %3902 = vmatmul.mubr.msk.f32.gmra.mxu1 %vm131_vm0, %v1531_v20  ;;  %v1533_v29 = vsel %vm5180_vm5, %v4198_v21, 0.0 }
 0xae8   :  { %v4200_v24 = vpop.eup %4199  ;;  %v1551_v38 = vsel %vm131_vm0, %v1533_v29, 0.0 }
 0xae9   :  { %v1532_v27 = vsel %vm5179_vm11, %v4200_v24, 0.0 }
 0xaea   :  { %v4202_v28 = vpop.eup %4201  ;;  %3904 = vmatprep.mubr.msk.f32.mxu1 %vm131_vm0, %v1532_v27  ;;  %v1548_v39 = vsel %vm131_vm0, %v1532_v27, 0.0 }
 0xaeb   :  { %3905 = vmatmul.mubr.msk.f32.gmra.mxu1 %vm131_vm0, %v1533_v29  ;;  %v1535_v30 = vsel %vm5178_vm3, %v4202_v28, 0.0 }
 0xaec   :  { %v4204_v31 = vpop.eup %4203  ;;  %v1557_v35 = vsel %vm131_vm0, %v1535_v30, 0.0 }
 0xaed   :  { %1558 = vadd.xlane.f32.xlu0 %v1557_v35  ;;  %v1534_v36 = vsel %vm5177_vm9, %v4204_v31, 0.0 }
 0xaee   :  { %3907 = vmatprep.mubr.msk.f32.mxu1 %vm131_vm0, %v1534_v36  ;;  %v1554_v37 = vsel %vm131_vm0, %v1534_v36, 0.0 }
 0xaef   :  { %3908 = vmatmul.mubr.msk.f32.gmra.mxu1 %vm131_vm0, %v1535_v30  ;;  %1555 = vadd.xlane.f32.xlu1 %v1554_v37 }
 0xaf0   :  { %3938 = vmatprep.mubr.msk.f32.mxu1 %vm4416_vm2, %v4415_v26 }
 0xaf1   :  { %1552 = vadd.xlane.f32.xlu0 %v1551_v38 }
 0xaf3   :  { %1549 = vadd.xlane.f32.xlu1 %v1548_v39 }
 0xaf5   :  { %1546 = vadd.xlane.f32.xlu0 %v1545_v42 }
 0xaf7   :  { %1543 = vadd.xlane.f32.xlu1 %v1542_v43 }
 0xaf9   :  { %1540 = vadd.xlane.f32.xlu0 %v1539_v44 }
 0xafb   :  { %1537 = vadd.xlane.f32.xlu1 %v1536_v45 }
 0xb76   :  { %v1559_v46 = vpop.xlane.xlu0 %1558 }
 0xb77   :  { %v1696_v62 = vadd.f32 1e-15, %v1559_v46 }
 0xb78   :  { %v1556_v47 = vpop.xlane.xlu1 %1555 }
 0xb79   :  { %v1695_v1 = vadd.f32 1e-15, %v1556_v47 }
 0xb7a   :  { %v1553_v49 = vpop.xlane.xlu0 %1552 }
 0xb7b   :  { %v1694_v56 = vadd.f32 1e-15, %v1553_v49 }
 0xb7c   :  { %v1550_v51 = vpop.xlane.xlu1 %1549 }
 0xb7d   :  { %v1693_v32 = vadd.f32 1e-15, %v1550_v51  ;;  %4205 = vrcp.f32 %v1694_v56 }
 0xb7e   :  { %v1547_v23 = vpop.xlane.xlu0 %1546 }
 0xb7f   :  { %v1692_v58 = vadd.f32 1e-15, %v1547_v23  ;;  %4207 = vrcp.f32 %v1693_v32 }
 0xb80   :  { %v1544_v55 = vpop.xlane.xlu1 %1543 }
 0xb81   :  { %v1691_v63 = vadd.f32 1e-15, %v1544_v55  ;;  %4209 = vrcp.f32 %v1692_v58 }
 0xb82   :  { %v1541_v11 = vpop.xlane.xlu0 %1540  ;;  %4211 = vrcp.f32 %v1696_v62 }
 0xb83   :  { %v1690_v34 = vadd.f32 1e-15, %v1541_v11  ;;  %4213 = vrcp.f32 %v1691_v63 }
 0xb84   :  { %v1538_v2 = vpop.xlane.xlu1 %1537  ;;  %4215 = vrcp.f32 %v1695_v1 }
 0xb85   :  { %v1689_v9 = vadd.f32 1e-15, %v1538_v2  ;;  %4217 = vrcp.f32 %v1690_v34 }
 0xb87   :  { %4219 = vrcp.f32 %v1689_v9 }
 0xb8a   :  { %v4206_v12 = vpop.eup %4205 }
 0xb8c   :  { %v4208_v4 = vpop.eup %4207 }
 0xb8e   :  { %v4210_v15 = vpop.eup %4209 }
 0xb8f   :  { %v4212_v17 = vpop.eup %4211 }
 0xb90   :  { %v4214_v24 = vpop.eup %4213 }
 0xb91   :  { %v4216_v28 = vpop.eup %4215 }
 0xb92   :  { %v4218_v35 = vpop.eup %4217 }
 0xb94   :  { %v4220_v44 = vpop.eup %4219 }
 0xba3   :  { %v3900_v7 = vpop.f32.mrf.mxu1 }
 0xba4   :  { %v4887_v38 = vmul.f32 %v4218_v35, %v3900_v7 }
 0xba5   :  { %v1650_v0 = vpop.f32.mrf.mxu1 }
 0xba6   :  { %v4890_v46 = vmul.f32 %v4220_v44, %v1650_v0  ;;  %v1722_v23 = vmin.f32 %v4887_v38, 0.0  ;;  %v1769_v44 = vld [vmem:[#allocation5 + $0xb8] sm:$0xff] }
 0xba7   :  { %v3903_v3 = vpop.f32.mrf.mxu1 }
 0xba8   :  { %v4883_v18 = vmul.f32 %v4210_v15, %v3903_v3  ;;  %v1721_v32 = vmin.f32 %v4890_v46, 0.0  ;;  %v1731_v62 = vmul.f32 1.442695, %v1722_v23  ;;  %v1763_v23 = vld [vmem:[#allocation5 + $0x88] sm:$0xff] }
 0xba9   :  { %v1660_v6 = vpop.f32.mrf.mxu1 }
 0xbaa   :  { %v4885_v29 = vmul.f32 %v4214_v24, %v1660_v6  ;;  %v1724_v39 = vmin.f32 %v4883_v18, 0.0  ;;  %v1729_v11 = vmul.f32 1.442695, %v1721_v32 }
 0xbab   :  { %v3906_v13 = vpop.f32.mrf.mxu1 }
 0xbac   :  { %v1708_v14 = vmul.f32 %v4206_v12, %v3906_v13  ;;  %v1723_v47 = vmin.f32 %v4885_v29, 0.0  ;;  %v1735_v55 = vmul.f32 1.442695, %v1724_v39  ;;  %v1773_v39 = vld [vmem:[#allocation5 + $0xd8] sm:$0xff] }
 0xbad   :  { %v1670_v16 = vpop.f32.mrf.mxu1 }
 0xbae   :  { %v1726_v20 = vmin.f32 %v1708_v14, 0.0  ;;  %v1706_v21 = vmul.f32 %v4208_v4, %v1670_v16  ;;  %v1733_v58 = vmul.f32 1.442695, %v1723_v47  ;;  %vm1718_vm14 = vcmp.gt.f32.partialorder %v1708_v14, 0.0  ;;  %v1766_v47 = vld [vmem:[#allocation5 + $0xa0] sm:$0xff] }
 0xbaf   :  { %v3909_v27 = vpop.f32.mrf.mxu1 }
 0xbb0   :  { %v1725_v30 = vmin.f32 %v1706_v21, 0.0  ;;  %v1712_v31 = vmul.f32 %v4212_v17, %v3909_v27  ;;  %v1739_v36 = vmul.f32 1.442695, %v1726_v20 }
 0xbb1   :  { %v1680_v37 = vpop.f32.mrf.mxu1 }
 0xbb2   :  { %v1728_v42 = vmin.f32 %v1712_v31, 0.0  ;;  %v1710_v43 = vmul.f32 %v4216_v28, %v1680_v37  ;;  %v1737_v45 = vmul.f32 1.442695, %v1725_v30  ;;  %4221 = vpow2.f32 %v1739_v36  ;;  %v1777_v36 = vld [vmem:[#allocation5 + $0xf8] sm:$0xff]  ;;  %v1775_v37 = vld [vmem:[#allocation5 + $0xe8] sm:$0xff] }
 0xbb3   :  { %vm1720_vm6 = vcmp.gt.f32.partialorder %v1712_v31, 0.0 }
 0xbb4   :  { %v1743_v49 = vmul.f32 1.442695, %v1728_v42  ;;  %v1727_v51 = vmin.f32 %v1710_v43, 0.0  ;;  %vm1719_vm8 = vcmp.gt.f32.partialorder %v1710_v43, 0.0  ;;  %v1771_v42 = vld [vmem:[#allocation5 + $0xc8] sm:$0xff] }
 0xbb6   :  { %4223 = vpow2.f32 %v1743_v49  ;;  %v1741_v56 = vmul.f32 1.442695, %v1727_v51  ;;  %v1765_v49 = vld [vmem:[#allocation5 + $0x98] sm:$0xff]  ;;  %v1764_v51 = vld [vmem:[#allocation5 + $0x90] sm:$0xff] }
 0xbb7   :  { %4225 = vpow2.f32 %v1737_v45  ;;  %v1768_v45 = vld [vmem:[#allocation5 + $0xb0] sm:$0xff] }
 0xbb8   :  { %4227 = vpow2.f32 %v1741_v56 }
 0xbb9   :  { %4229 = vpow2.f32 %v1735_v55  ;;  %v1762_v55 = vld [vmem:[#allocation5 + $0x80] sm:$0xff] }
 0xbba   :  { %4231 = vpow2.f32 %v1733_v58 }
 0xbbb   :  { %4233 = vpow2.f32 %v1731_v62 }
 0xbbc   :  { %4235 = vpow2.f32 %v1729_v11 }
 0xbbf   :  { %v4222_v63 = vpop.eup %4221 }
 0xbc0   :  { %v3337_v3 = vadd.f32 -1.0, %v4222_v63 }
 0xbc2   :  { %v4903_v15 = vsel %vm1718_vm14, %v1708_v14, %v3337_v3  ;;  %vm1715_vm14 = vcmp.gt.f32.partialorder %v4885_v29, 0.0 }
 0xbc3   :  { %v4224_v1 = vpop.eup %4223 }
 0xbc4   :  { %v4226_v2 = vpop.eup %4225  ;;  %v3339_v34 = vadd.f32 -1.0, %v4224_v1 }
 0xbc5   :  { %v4228_v9 = vpop.eup %4227  ;;  %v3336_v13 = vadd.f32 -1.0, %v4226_v2 }
 0xbc6   :  { %v4895_v7 = vsel %vm1720_vm6, %v1712_v31, %v3339_v34  ;;  %v3338_v0 = vadd.f32 -1.0, %v4228_v9  ;;  %v4230_v6 = vpop.eup %4229  ;;  %vm1717_vm6 = vcmp.gt.f32.partialorder %v1706_v21, 0.0 }
 0xbc7   :  { %3910 = vmatprep.subr.mxu0 %v4895_v7  ;;  %v4232_v4 = vpop.eup %4231  ;;  %v3335_v16 = vadd.f32 -1.0, %v4230_v6  ;;  %v4907_v20 = vsel %vm1717_vm6, %v1706_v21, %v3336_v13  ;;  %vm1714_vm6 = vcmp.gt.f32.partialorder %v4887_v38, 0.0 }
 0xbc8   :  { %3911 = vmatpush3.msra.mxu0 %v4895_v7  ;;  %v4899_v12 = vsel %vm1719_vm8, %v1710_v43, %v3338_v0  ;;  %v4234_v17 = vpop.eup %4233  ;;  %v3334_v24 = vadd.f32 -1.0, %v4232_v4  ;;  %vm1716_vm8 = vcmp.gt.f32.partialorder %v4883_v18, 0.0  ;;  %v1770_v43 = vld [vmem:[#allocation5 + $0xc0] sm:$0xff] }
 0xbc9   :  { %3912 = vmatprep.subr.mxu0 %v4899_v12  ;;  %v4236_v27 = vpop.eup %4235  ;;  %v4913_v14 = vsel %vm1716_vm8, %v4883_v18, %v3335_v16  ;;  %v3333_v28 = vadd.f32 -1.0, %v4234_v17  ;;  %vm1713_vm8 = vcmp.gt.f32.partialorder %v4890_v46, 0.0  ;;  %v4291_v16 = vld [vmem:[%s5164_s3] sm:$0xff] }
 0xbca   :  { %3913 = vmatpush3.msra.mxu0 %v4899_v12  ;;  %v4919_v21 = vsel %vm1715_vm14, %v4885_v29, %v3334_v24  ;;  %v3332_v30 = vadd.f32 -1.0, %v4236_v27 }
 0xbcb   :  { %3914 = vmatprep.subr.mxu0 %v4903_v15  ;;  %v4925_v18 = vsel %vm1714_vm6, %v4887_v38, %v3333_v28  ;;  %v1774_v38 = vld [vmem:[#allocation5 + $0xe0] sm:$0xff] }
 0xbcc   :  { %3915 = vmatpush3.msra.mxu0 %v4903_v15  ;;  %v4931_v31 = vsel %vm1713_vm8, %v4890_v46, %v3332_v30  ;;  %v1767_v46 = vld [vmem:[#allocation5 + $0xa8] sm:$0xff]  ;;  %v1796_v30 = vld [vmem:[#allocation7 + $0xf8] sm:$0xff] }
 0xbcd   :  { %3916 = vmatprep.subr.mxu0 %v4907_v20 }
 0xbce   :  { %3917 = vmatpush3.msra.mxu0 %v4907_v20 }
 0xbcf   :  { %3918 = vmatprep.subr.mxu0 %v4913_v14 }
 0xbd0   :  { %3919 = vmatpush3.msra.mxu0 %v4913_v14 }
 0xbd1   :  { %3920 = vmatprep.subr.mxu0 %v4919_v21 }
 0xbd2   :  { %3921 = vmatpush3.msra.mxu0 %v4919_v21 }
 0xbd3   :  { %3922 = vmatprep.subr.mxu0 %v4925_v18 }
 0xbd4   :  { %3923 = vmatpush3.msra.mxu0 %v4925_v18 }
 0xbd5   :  { %3924 = vmatprep.subr.mxu0 %v4931_v31 }
 0xbd6   :  { %3925 = vmatpush3.msra.mxu0 %v4931_v31 }
 0xbd7   :  { %3927 = vmatmul.mubr.msk.f32.vlgmr.msra.gmra.mxu0 %vm131_vm0, %v4560_v25  ;;  %3929 = vmatprep.subr.mxu0 %v4415_v26  ;;  %v1776_v25 = vld [vmem:[#allocation5 + $0xf0] sm:$0xff] }
 0xbd8   :  { %3933 = vmatprep.mubr.msk.f32.mxu0 %vm4416_vm2, %v4415_v26 }
 0xc97   :  { %v4940_v29 = vpop.f32.mrf.mxu0 }
 0xc98   :  { %3930 = vmatpush3.msra.mxu0 %v4940_v29 }
 0xc99   :  { %v4943_v35 = vpop.f32.mrf.mxu0  ;;  %3931 = vmatprep.subr.mxu0 %v4415_v26 }
 0xc9a   :  { %3932 = vmatpush3.msra.mxu0 %v4943_v35 }
 0xc9b   :  { %3934 = vmatmul.mubr.msk.f32.vlgmr.msra.gmra.mxu0 %vm148_vm1, %v4569_v33  ;;  %3941 = vmatprep.subr.mxu0 %v4415_v26  ;;  %v1772_v33 = vld [vmem:[#allocation5 + $0xd0] sm:$0xff] }
 0xc9c   :  { %3942 = vmatpush3.msra.mxu0 %v1777_v36  ;;  %3973 = vmatprep.mubr.msk.f32.mxu0 %vm4416_vm2, %v4415_v26  ;;  %v1795_v36 = vld [vmem:[#allocation7 + $0xf0] sm:$0xff] }
 0xc9d   :  { %3943 = vmatprep.subr.mxu0 %v4415_v26 }
 0xc9e   :  { %3944 = vmatpush3.msra.mxu0 %v1776_v25  ;;  %v4292_v25 = vld [vmem:[%s5164_s3 + $0x8] sm:$0xff] }
 0xc9f   :  { %3945 = vmatprep.subr.mxu0 %v4415_v26 }
 0xca0   :  { %3946 = vmatpush3.msra.mxu0 %v1775_v37  ;;  %v1794_v37 = vld [vmem:[#allocation7 + $0xe8] sm:$0xff] }
 0xca1   :  { %3947 = vmatprep.subr.mxu0 %v4415_v26 }
 0xca2   :  { %3948 = vmatpush3.msra.mxu0 %v1774_v38  ;;  %v1793_v38 = vld [vmem:[#allocation7 + $0xe0] sm:$0xff] }
 0xca3   :  { %3949 = vmatprep.subr.mxu0 %v4415_v26 }
 0xca4   :  { %3950 = vmatpush3.msra.mxu0 %v1773_v39  ;;  %v1792_v39 = vld [vmem:[#allocation7 + $0xd8] sm:$0xff] }
 0xca5   :  { %3951 = vmatprep.subr.mxu0 %v4415_v26 }
 0xca6   :  { %3952 = vmatpush3.msra.mxu0 %v1772_v33  ;;  %v1791_v33 = vld [vmem:[#allocation7 + $0xd0] sm:$0xff] }
 0xca7   :  { %3953 = vmatprep.subr.mxu0 %v4415_v26 }
 0xca8   :  { %3954 = vmatpush3.msra.mxu0 %v1771_v42  ;;  %v1790_v42 = vld [vmem:[#allocation7 + $0xc8] sm:$0xff] }
 0xca9   :  { %3955 = vmatprep.subr.mxu0 %v4415_v26 }
 0xcaa   :  { %3956 = vmatpush3.msra.mxu0 %v1770_v43  ;;  %v1789_v43 = vld [vmem:[#allocation7 + $0xc0] sm:$0xff] }
 0xcab   :  { %3957 = vmatprep.subr.mxu0 %v4415_v26 }
 0xcac   :  { %3958 = vmatpush3.msra.mxu0 %v1769_v44  ;;  %v1788_v44 = vld [vmem:[#allocation7 + $0xb8] sm:$0xff] }
 0xcad   :  { %3959 = vmatprep.subr.mxu0 %v4415_v26 }
 0xcae   :  { %3960 = vmatpush3.msra.mxu0 %v1768_v45  ;;  %v1787_v45 = vld [vmem:[#allocation7 + $0xb0] sm:$0xff] }
 0xcaf   :  { %3961 = vmatprep.subr.mxu0 %v4415_v26 }
 0xcb0   :  { %3962 = vmatpush3.msra.mxu0 %v1767_v46  ;;  %v1786_v46 = vld [vmem:[#allocation7 + $0xa8] sm:$0xff] }
 0xcb1   :  { %3963 = vmatprep.subr.mxu0 %v4415_v26 }
 0xcb2   :  { %3964 = vmatpush3.msra.mxu0 %v1766_v47  ;;  %v1785_v47 = vld [vmem:[#allocation7 + $0xa0] sm:$0xff] }
 0xcb3   :  { %3965 = vmatprep.subr.mxu0 %v4415_v26 }
 0xcb4   :  { %3966 = vmatpush3.msra.mxu0 %v1765_v49  ;;  %v1784_v49 = vld [vmem:[#allocation7 + $0x98] sm:$0xff] }
 0xcb5   :  { %3967 = vmatprep.subr.mxu0 %v4415_v26 }
 0xcb6   :  { %3968 = vmatpush3.msra.mxu0 %v1764_v51  ;;  %v1783_v51 = vld [vmem:[#allocation7 + $0x90] sm:$0xff] }
 0xcb7   :  { %3969 = vmatprep.subr.mxu0 %v4415_v26 }
 0xcb8   :  { %3970 = vmatpush3.msra.mxu0 %v1763_v23  ;;  %v1782_v23 = vld [vmem:[#allocation7 + $0x88] sm:$0xff] }
 0xcb9   :  { %3971 = vmatprep.subr.mxu0 %v4415_v26 }
 0xcba   :  { %3972 = vmatpush3.msra.mxu0 %v1762_v55  ;;  %v1781_v55 = vld [vmem:[#allocation7 + $0x80] sm:$0xff] }
 0xd5b   :  { %v1959_v56 = vpop.f32.mrf.mxu0 }
 0xd5c   :  { %3937 = vmatpush3.xpose.msra.mxu1 %v1959_v56  ;;  %3974 = vmatmul.mubr.f32.vlgmr.msra.gmra.mxu0 %v1959_v56 }
 0xd5d   :  { %v3935_v32 = vpop.f32.mrf.mxu0  ;;  %3976 = vmatprep.subr.mxu1 %v4415_v26  ;;  %4025 = vmatprep.mubr.msk.f32.mxu0 %vm148_vm1, %v4642_v19 }
 0xd5f   :  { %3939 = vmatmul.mubr.f32.vlgmr.msra.gmra.mxu1 %v1959_v56 }
 0xd60   :  { %3978 = vmatprep.mubr.msk.f32.mxu1 %vm4416_vm2, %v4415_v26  ;;  %vm5182_vm2 = vcmp.eq.s32.totalorder %v4604_v60, 1 }
 0xd61   :  { %vm5184_vm14 = vmmov %vm5182_vm2 }
 0xd62   :  { %vm5187_vm9 = vmmov %vm5182_vm2 }
 0xd63   :  { %vm5189_vm11 = vmmov %vm5182_vm2 }
 0xe1c   :  { %v2112_v58 = vpop.f32.mrf.mxu0 }
 0xe1e   :  { %v3975_v62 = vpop.f32.mrf.mxu0 }
 0xe1f   :  { %v2029_v11 = vpop.f32.mrf.mxu1 }
 0xe20   :  { %v3346_v63 = vmul.f32 -1.442695, %v2029_v11 }
 0xe21   :  { %v3940_v1 = vpop.f32.mrf.mxu1 }
 0xe22   :  { %4237 = vpow2.f32 %v3346_v63 }
 0xe2f   :  { %v4238_v2 = vpop.eup %4237 }
 0xe30   :  { %v2036_v34 = vadd.f32 1.0, %v4238_v2 }
 0xe32   :  { %4239 = vrcp.f32 %v2036_v34 }
 0xe3f   :  { %v4240_v9 = vpop.eup %4239 }
 0xe40   :  { %v2039_v0 = vadd.f32 %v4240_v9, %v4609_v61 }
 0xe42   :  { %v2040_v3 = vadd.f32 %v4609_v61, %v2039_v0  ;;  %v3348_v61 = vld [vmem:[%s5169_s8 + $0x1] ss:$0 sm:$0xff] }
 0xe44   :  { %v2041_v6 = vand.u32 2147483647, %v2040_v3 }
 0xe46   :  { %v2042_v19 = vsel %vm157_vm4, %v2041_v6, 0.0 }
 0xe47   :  { %2043 = vadd.xlane.f32.xlu0 %v2042_v19 }
 0xed0   :  { %v2044_v13 = vpop.xlane.xlu0 %2043 }
 0xed1   :  { %4241 = vrsqrt.f32 %v2044_v13 }
 0xede   :  { %v4242_v26 = vpop.eup %4241 }
 0xedf   :  { %v2116_v4 = vmul.f32 %v4242_v26, %v2112_v58 }
 0xee1   :  { %3977 = vmatpush3.msra.mxu1 %v2116_v4  ;;  %v1814_v4 = vld [vmem:[#allocation8 + $0xf0] sm:$0xff] }
 0xee2   :  { %3979 = vmatmul.mubr.msk.f32.vlgmr.msra.gmra.mxu1 %vm157_vm4, %v2040_v3 }
 0xee3   :  { %3983 = vmatprep.mubr.msk.f32.mxu1 %vm157_vm4, %v4291_v16  ;;  %v4294_v16 = vld [vmem:[%s5163_s2 + $0x8] sm:$0xff] }
 0xfa2   :  { %v2186_v17 = vpop.f32.mrf.mxu1 }
 0xfa3   :  { %v2190_v24 = vmul.f32 %v4242_v26, %v2186_v17  ;;  %v4296_v17 = vld [vmem:[%s5163_s2 + $0x18] sm:$0xff] }
 0xfa4   :  { %v3980_v27 = vpop.f32.mrf.mxu1 }
 0xfa5   :  { %v2197_v28 = vadd.f32 %v3348_v61, %v2190_v24  ;;  %v1812_v61 = vld [vmem:[#allocation8 + $0xe0] sm:$0xff]  ;;  %v1811_v27 = vld [vmem:[#allocation8 + $0xd8] sm:$0xff] }
 0xfa6   :  { %v4297_v24 = vld [vmem:[%s5163_s2 + $0x20] sm:$0xff] }
 0xfa7   :  { %3981 = vmatprep.subr.mxu1 %v2197_v28 }
 0xfa8   :  { %3982 = vmatpush3.msra.mxu1 %v2197_v28  ;;  %v1810_v28 = vld [vmem:[#allocation8 + $0xd0] sm:$0xff] }
 0xfa9   :  { %3984 = vmatmul.mubr.msk.f32.vlgmr.msra.gmra.mxu1 %vm157_vm4, %v4292_v25  ;;  %3986 = vmatprep.subr.mxu1 %v1796_v30  ;;  %v1809_v25 = vld [vmem:[#allocation8 + $0xc8] sm:$0xff] }
 0xfaa   :  { %3987 = vmatpush3.msra.mxu1 %v1796_v30  ;;  %v4298_v30 = vld [vmem:[%s5163_s2 + $0x28] sm:$0xff] }
 0xfab   :  { %3988 = vmatprep.subr.mxu1 %v1795_v36 }
 0xfac   :  { %3989 = vmatpush3.msra.mxu1 %v1795_v36  ;;  %v4299_v36 = vld [vmem:[%s5163_s2 + $0x30] sm:$0xff] }
 0xfad   :  { %3990 = vmatprep.subr.mxu1 %v1794_v37 }
 0xfae   :  { %3991 = vmatpush3.msra.mxu1 %v1794_v37  ;;  %v1808_v37 = vld [vmem:[#allocation8 + $0xc0] sm:$0xff] }
 0xfaf   :  { %3992 = vmatprep.subr.mxu1 %v1793_v38 }
 0xfb0   :  { %3993 = vmatpush3.msra.mxu1 %v1793_v38  ;;  %v4300_v38 = vld [vmem:[%s5163_s2 + $0x38] sm:$0xff] }
 0xfb1   :  { %3994 = vmatprep.subr.mxu1 %v1792_v39 }
 0xfb2   :  { %3995 = vmatpush3.msra.mxu1 %v1792_v39  ;;  %v1807_v39 = vld [vmem:[#allocation8 + $0xb8] sm:$0xff] }
 0xfb3   :  { %3996 = vmatprep.subr.mxu1 %v1791_v33 }
 0xfb4   :  { %3997 = vmatpush3.msra.mxu1 %v1791_v33  ;;  %v1806_v33 = vld [vmem:[#allocation8 + $0xb0] sm:$0xff] }
 0xfb5   :  { %3998 = vmatprep.subr.mxu1 %v1790_v42 }
 0xfb6   :  { %3999 = vmatpush3.msra.mxu1 %v1790_v42  ;;  %v1805_v42 = vld [vmem:[#allocation8 + $0xa8] sm:$0xff] }
 0xfb7   :  { %4000 = vmatprep.subr.mxu1 %v1789_v43 }
 0xfb8   :  { %4001 = vmatpush3.msra.mxu1 %v1789_v43  ;;  %v1804_v43 = vld [vmem:[#allocation8 + $0xa0] sm:$0xff] }
 0xfb9   :  { %4002 = vmatprep.subr.mxu1 %v1788_v44 }
 0xfba   :  { %4003 = vmatpush3.msra.mxu1 %v1788_v44  ;;  %v1803_v44 = vld [vmem:[#allocation8 + $0x98] sm:$0xff] }
 0xfbb   :  { %4004 = vmatprep.subr.mxu1 %v1787_v45 }
 0xfbc   :  { %4005 = vmatpush3.msra.mxu1 %v1787_v45  ;;  %v1802_v45 = vld [vmem:[#allocation8 + $0x90] sm:$0xff] }
 0xfbd   :  { %4006 = vmatprep.subr.mxu1 %v1786_v46 }
 0xfbe   :  { %4007 = vmatpush3.msra.mxu1 %v1786_v46  ;;  %v1801_v46 = vld [vmem:[#allocation8 + $0x88] sm:$0xff] }
 0xfbf   :  { %4008 = vmatprep.subr.mxu1 %v1785_v47 }
 0xfc0   :  { %4009 = vmatpush3.msra.mxu1 %v1785_v47  ;;  %v1800_v47 = vld [vmem:[#allocation8 + $0x80] sm:$0xff] }
 0xfc1   :  { %4010 = vmatprep.subr.mxu1 %v1784_v49 }
 0xfc2   :  { %4011 = vmatpush3.msra.mxu1 %v1784_v49 }
 0xfc3   :  { %4012 = vmatprep.subr.mxu1 %v1783_v51 }
 0xfc4   :  { %4013 = vmatpush3.msra.mxu1 %v1783_v51 }
 0xfc5   :  { %4014 = vmatprep.subr.mxu1 %v1782_v23 }
 0xfc6   :  { %4015 = vmatpush3.msra.mxu1 %v1782_v23 }
 0xfc7   :  { %4016 = vmatprep.subr.mxu1 %v1781_v55 }
 0xfc8   :  { %4017 = vmatpush3.msra.mxu1 %v1781_v55 }
0x1069   :  { %v3985_v56 = vpop.f32.mrf.mxu1 }
0x106a   :  { %v2274_v32 = vmul.f32 %v4652_v40, %v3985_v56  ;;  %v4293_v40 = vld [vmem:[%s5163_s2] sm:$0xff] }
0x106b   :  { %v2264_v58 = vpop.f32.mrf.mxu1 }
0x106c   :  { %v2273_v62 = vmul.f32 %v4654_v41, %v2264_v58  ;;  %v2276_v11 = vmul.f32 0.15, %v2274_v32  ;;  %v3353_v41 = vld [vmem:[%s5171_s10 + $0x1] ss:$0 sm:$0xff] }
0x106e   :  { %v2275_v63 = vmul.f32 0.15, %v2273_v62  ;;  %v2278_v2 = vadd.f32 %v4940_v29, %v2276_v11 }
0x1070   :  { %v2277_v1 = vadd.f32 %v2275_v63, %v4943_v35 }
0x1072   :  { %4018 = vmatprep.mubr.f32.mxu1 %v2277_v1 }
0x1073   :  { %4019 = vmatmul.mubr.f32.vlgmr.msra.gmra.mxu1 %v2278_v2 }
0x1133   :  { %v4020_v34 = vpop.f32.mrf.mxu1 }
0x1134   :  { %v2355_v9 = vmul.f32 %v4660_v52, %v4020_v34 }
0x1135   :  { %v2345_v0 = vpop.f32.mrf.mxu1 }
0x1136   :  { %v2354_v3 = vmul.f32 %v4662_v53, %v2345_v0  ;;  %4021 = vmatprep.subr.mxu0 %v2355_v9 }
0x1137   :  { %4022 = vmatpush3.msra.mxu0 %v2355_v9 }
0x1138   :  { %4023 = vmatprep.subr.mxu0 %v2354_v3 }
0x1139   :  { %4024 = vmatpush3.msra.mxu0 %v2354_v3 }
0x113a   :  { %4026 = vmatmul.mubr.msk.f32.vlgmr.msra.gmra.mxu0 %vm148_vm1, %v4647_v22  ;;  %v1815_v22 = vld [vmem:[#allocation8 + $0xf8] sm:$0xff] }
0x113b   :  { %4032 = vmatprep.mubr.msk.f32.mxu0 %vm148_vm1, %v4293_v40 }
0x11fa   :  { %v4027_v29 = vpop.f32.mrf.mxu0 }
0x11fb   :  { %v2432_v35 = vmul.f32 %v4660_v52, %v4027_v29  ;;  %v4295_v52 = vld [vmem:[%s5163_s2 + $0x10] sm:$0xff] }
0x11fc   :  { %v2422_v6 = vpop.f32.mrf.mxu0 }
0x11fd   :  { %v2440_v19 = vadd.f32 %v3353_v41, %v2432_v35  ;;  %v2431_v13 = vmul.f32 %v4662_v53, %v2422_v6  ;;  %v1813_v53 = vld [vmem:[#allocation8 + $0xe8] sm:$0xff] }
0x11ff   :  { %v2439_v26 = vadd.f32 %v3353_v41, %v2431_v13  ;;  %4028 = vmatprep.subr.mxu0 %v2440_v19 }
0x1200   :  { %4029 = vmatpush3.msra.mxu0 %v2440_v19 }
0x1201   :  { %4030 = vmatprep.subr.mxu0 %v2439_v26 }
0x1202   :  { %4031 = vmatpush3.msra.mxu0 %v2439_v26 }
0x1203   :  { %4033 = vmatmul.mubr.msk.f32.vlgmr.msra.gmra.mxu0 %vm148_vm1, %v4294_v16  ;;  %4044 = vmatprep.subr.mxu0 %v1815_v22 }
0x1204   :  { %4035 = vmatprep.mubr.msk.f32.mxu0 %vm148_vm1, %v4295_v52  ;;  %4045 = vmatpush3.msra.mxu0 %v1815_v22 }
0x1205   :  { %4046 = vmatprep.subr.mxu0 %v1814_v4 }
0x1206   :  { %4047 = vmatpush3.msra.mxu0 %v1814_v4 }
0x1207   :  { %4036 = vmatmul.mubr.msk.f32.gmra.mxu0 %vm148_vm1, %v4296_v17  ;;  %4048 = vmatprep.subr.mxu0 %v1813_v53 }
0x1208   :  { %4038 = vmatprep.mubr.msk.f32.mxu0 %vm148_vm1, %v4297_v24  ;;  %4049 = vmatpush3.msra.mxu0 %v1813_v53 }
0x1209   :  { %4050 = vmatprep.subr.mxu0 %v1812_v61 }
0x120a   :  { %4051 = vmatpush3.msra.mxu0 %v1812_v61 }
0x120b   :  { %4039 = vmatmul.mubr.msk.f32.gmra.mxu0 %vm148_vm1, %v4298_v30  ;;  %4052 = vmatprep.subr.mxu0 %v1811_v27 }
0x120c   :  { %4041 = vmatprep.mubr.msk.f32.mxu0 %vm148_vm1, %v4299_v36  ;;  %4053 = vmatpush3.msra.mxu0 %v1811_v27 }
0x120d   :  { %4054 = vmatprep.subr.mxu0 %v1810_v28 }
0x120e   :  { %4055 = vmatpush3.msra.mxu0 %v1810_v28 }
0x120f   :  { %4042 = vmatmul.mubr.msk.f32.gmra.mxu0 %vm148_vm1, %v4300_v38  ;;  %4056 = vmatprep.subr.mxu0 %v1809_v25  ;;  %vm5181_vm1 = vcmask 15360  }
0x1210   :  { %4057 = vmatpush3.msra.mxu0 %v1809_v25  ;;  %vm5183_vm4 = vmmov %vm5181_vm1 }
0x1211   :  { %4058 = vmatprep.subr.mxu0 %v1808_v37  ;;  %vm5185_vm6 = vmmov %vm5181_vm1 }
0x1212   :  { %4059 = vmatpush3.msra.mxu0 %v1808_v37  ;;  %vm5186_vm8 = vmmov %vm5181_vm1 }
0x1213   :  { %4060 = vmatprep.subr.mxu0 %v1807_v39  ;;  %vm5188_vm3 = vmmov %vm5181_vm1 }
0x1214   :  { %4061 = vmatpush3.msra.mxu0 %v1807_v39  ;;  %vm5202_vm5 = vmmov %vm5181_vm1 }
0x1215   :  { %4062 = vmatprep.subr.mxu0 %v1806_v33 }
0x1216   :  { %4063 = vmatpush3.msra.mxu0 %v1806_v33 }
0x1217   :  { %4064 = vmatprep.subr.mxu0 %v1805_v42 }
0x1218   :  { %4065 = vmatpush3.msra.mxu0 %v1805_v42 }
0x1219   :  { %4066 = vmatprep.subr.mxu0 %v1804_v43 }
0x121a   :  { %4067 = vmatpush3.msra.mxu0 %v1804_v43 }
0x121b   :  { %4068 = vmatprep.subr.mxu0 %v1803_v44 }
0x121c   :  { %4069 = vmatpush3.msra.mxu0 %v1803_v44 }
0x121d   :  { %4070 = vmatprep.subr.mxu0 %v1802_v45 }
0x121e   :  { %4071 = vmatpush3.msra.mxu0 %v1802_v45 }
0x121f   :  { %4072 = vmatprep.subr.mxu0 %v1801_v46 }
0x1220   :  { %4073 = vmatpush3.msra.mxu0 %v1801_v46 }
0x1221   :  { %4074 = vmatprep.subr.mxu0 %v1800_v47 }
0x1222   :  { %4075 = vmatpush3.msra.mxu0 %v1800_v47 }
0x12c3   :  { %v4034_v49 = vpop.f32.mrf.mxu0 }
0x12c4   :  { %v2547_v51 = vmul.f32 0.5, %v4034_v49 }
0x12c5   :  { %v2507_v23 = vpop.f32.mrf.mxu0 }
0x12c6   :  { %v2546_v55 = vmul.f32 0.5, %v2507_v23  ;;  %v2555_v58 = vadd.f32 %v2547_v51, %v4925_v18 }
0x12c7   :  { %v4037_v56 = vpop.f32.mrf.mxu0 }
0x12c8   :  { %v2554_v32 = vadd.f32 %v2546_v55, %v4931_v31  ;;  %v2549_v62 = vmul.f32 0.5, %v4037_v56 }
0x12c9   :  { %v2517_v11 = vpop.f32.mrf.mxu0 }
0x12ca   :  { %v2548_v63 = vmul.f32 0.5, %v2517_v11  ;;  %4076 = vmatprep.mubr.f32.mxu0 %v2554_v32  ;;  %v2557_v34 = vadd.f32 %v2549_v62, %v4913_v14  ;;  %v3342_v14 = vld [vmem:[%s5173_s12 + $0x2] sm:$0x3]  ;;  %s4417_s12 = smov [#allocation10]  }
0x12cb   :  { %v4040_v1 = vpop.f32.mrf.mxu0  ;;  %4077 = vmatmul.mubr.f32.vlgmr.msra.gmra.mxu0 %v2555_v58  ;;  %4088 = vmatprep.subr.mxu1 %v3342_v14  ;;  %s3267_s16 = sshll.u32 %s4417_s12, 4  ;;  %s3268_s16 = int_to_ptr.vmem [resolvable:$true] %s3267_s16 }
0x12cc   :  { %v2556_v2 = vadd.f32 %v2548_v63, %v4919_v21  ;;  %v2551_v9 = vmul.f32 0.5, %v4040_v1  ;;  %4089 = vmatpush3.xpose.msra.mxu1 %v3342_v14  ;;  %s4381_s5 = scalar_lea.vmem %s3268_s16, 1024  ;;  %p4386_p7 = scmp.lt.s32.totalorder %s3268_s16, %s3268_s16 }
0x12cd   :  { %v2527_v0 = vpop.f32.mrf.mxu0  ;;  %p4382_p6 = scmp.ne.s32.totalorder %s3268_s16, %s4381_s5  ;;  %p4387_p8 = scmp.lt.s32.totalorder %s4381_s5, %s4381_s5 }
0x12ce   :  { %v2550_v3 = vmul.f32 0.5, %v2527_v0  ;;  %4079 = vmatprep.mubr.f32.mxu0 %v2556_v2  ;;  %v2559_v18 = vadd.f32 %v2551_v9, %v4903_v15 }
0x12cf   :  { %v4043_v40 = vpop.f32.mrf.mxu0  ;;  %4080 = vmatmul.mubr.f32.gmra.mxu0 %v2557_v34  ;;  %p4388_p9 = por %p4387_p8, %p4386_p7 }
0x12d0   :  { %v2558_v31 = vadd.f32 %v2550_v3, %v4907_v20  ;;  %v2553_v41 = vmul.f32 0.5, %v4043_v40 }
0x12d1   :  { %v2537_v29 = vpop.f32.mrf.mxu0  ;;  %p4389_p10 = pnand %p4388_p9, %p4382_p6 }
0x12d2   :  { %v2552_v35 = vmul.f32 0.5, %v2537_v29  ;;  %4082 = vmatprep.mubr.f32.mxu0 %v2558_v31  ;;  %v2561_v21 = vadd.f32 %v2553_v41, %v4895_v7 }
0x12d3   :  { %4083 = vmatmul.mubr.f32.gmra.mxu0 %v2559_v18 }
0x12d4   :  { %v2560_v6 = vadd.f32 %v2552_v35, %v4899_v12 }
0x12d6   :  { %4085 = vmatprep.mubr.f32.mxu0 %v2560_v6 }
0x12d7   :  { %4086 = vmatmul.mubr.f32.gmra.mxu0 %v2561_v21 }
0x138b   :  { %v4078_v20 = vpop.f32.mrf.mxu0 }
0x138d   :  { %v2628_v19 = vpop.f32.mrf.mxu0 }
0x138e   :  { %4090 = vmatprep.mubr.f32.mxu1 %v2628_v19 }
0x138f   :  { %v4081_v15 = vpop.f32.mrf.mxu0  ;;  %4091 = vmatmul.mubr.f32.vlgmr.msra.gmra.mxu1 %v4078_v20 }
0x1391   :  { %v2638_v13 = vpop.f32.mrf.mxu0 }
0x1392   :  { %4093 = vmatprep.mubr.f32.mxu1 %v2638_v13 }
0x1393   :  { %v4084_v26 = vpop.f32.mrf.mxu0  ;;  %4094 = vmatmul.mubr.f32.gmra.mxu1 %v4081_v15 }
0x1395   :  { %v2648_v12 = vpop.f32.mrf.mxu0 }
0x1396   :  { %4096 = vmatprep.mubr.f32.mxu1 %v2648_v12 }
0x1397   :  { %v4087_v7 = vpop.f32.mrf.mxu0  ;;  %4097 = vmatmul.mubr.f32.gmra.mxu1 %v4084_v26 }
0x1398   :  { %4130 = vmatprep.subr.mxu0 %v4087_v7 }
0x1399   :  { %v2658_v22 = vpop.f32.mrf.mxu0  ;;  %4131 = vmatpush3.msra.mxu0 %v4087_v7 }
0x139a   :  { %4099 = vmatprep.mubr.f32.mxu1 %v2658_v22  ;;  %4132 = vmatprep.subr.mxu0 %v2658_v22 }
0x139b   :  { %4100 = vmatmul.mubr.f32.gmra.mxu1 %v4087_v7  ;;  %4133 = vmatpush3.msra.mxu0 %v2658_v22 }
0x139c   :  { %4134 = vmatprep.subr.mxu0 %v4084_v26 }
0x139d   :  { %4135 = vmatpush3.msra.mxu0 %v4084_v26 }
0x139e   :  { %4136 = vmatprep.subr.mxu0 %v2648_v12 }
0x139f   :  { %4137 = vmatpush3.msra.mxu0 %v2648_v12 }
0x13a0   :  { %4138 = vmatprep.subr.mxu0 %v4081_v15 }
0x13a1   :  { %4139 = vmatpush3.msra.mxu0 %v4081_v15 }
0x13a2   :  { %4140 = vmatprep.subr.mxu0 %v2638_v13 }
0x13a3   :  { %4141 = vmatpush3.msra.mxu0 %v2638_v13 }
0x13a4   :  { %4142 = vmatprep.subr.mxu0 %v4078_v20 }
0x13a5   :  { %4143 = vmatpush3.msra.mxu0 %v4078_v20 }
0x13a6   :  { %4144 = vmatprep.subr.mxu0 %v2628_v19 }
0x13a7   :  { %4145 = vmatpush3.msra.mxu0 %v2628_v19 }
0x144f   :  { %v4092_v4 = vpop.f32.mrf.mxu1 }
0x1450   :  { %v2773_v43 = vsel %vm1268_vm7, %v4092_v4, 1.0 }
0x1451   :  { %v2733_v16 = vpop.f32.mrf.mxu1 }
0x1452   :  { %v2772_v52 = vsel %vm1268_vm7, %v2733_v16, 1.0 }
0x1453   :  { %v4095_v53 = vpop.f32.mrf.mxu1  ;;  %4118 = vmatprep.mubr.msk.f32.mxu1 %vm5181_vm1, %v2772_v52 }
0x1454   :  { %v2775_v45 = vsel %vm1268_vm7, %v4095_v53, 1.0 }
0x1455   :  { %v2743_v61 = vpop.f32.mrf.mxu1 }
0x1456   :  { %v2782_v39 = vsel %vm5187_vm9, %v2743_v61, 1.0  ;;  %v2774_v44 = vsel %vm1268_vm7, %v2743_v61, 1.0 }
0x1457   :  { %v4098_v17 = vpop.f32.mrf.mxu1 }
0x1458   :  { %v2785_v25 = vsel %vm5187_vm9, %v4098_v17, 1.0  ;;  %v2777_v47 = vsel %vm1268_vm7, %v4098_v17, 1.0 }
0x1459   :  { %v2753_v24 = vpop.f32.mrf.mxu1 }
0x145a   :  { %v2784_v37 = vsel %vm5189_vm11, %v2753_v24, 1.0  ;;  %vm5196_vm11 = vmmov %vm5187_vm9  ;;  %v2776_v46 = vsel %vm1268_vm7, %v2753_v24, 1.0 }
0x145b   :  { %v4101_v27 = vpop.f32.mrf.mxu1  ;;  %v2781_v33 = vsel %vm5196_vm11, %v4092_v4, 1.0  ;;  %vm5205_vm11 = vmmov %vm5181_vm1 }
0x145c   :  { %v2787_v28 = vsel %vm5182_vm2, %v4101_v27, 1.0  ;;  %vm5190_vm2 = vmmov %vm5181_vm1  ;;  %v2779_v51 = vsel %vm1268_vm7, %v4101_v27, 1.0 }
0x145d   :  { %v2763_v30 = vpop.f32.mrf.mxu1  ;;  %4102 = vmatprep.subr.msk.mxu1 %vm5183_vm4, %v2787_v28  ;;  %vm5191_vm4 = vmmov %vm5181_vm1 }
0x145e   :  { %v2786_v36 = vsel %vm5184_vm14, %v2763_v30, 1.0  ;;  %4103 = vmatpush3.xpose.msk.msra.mxu1 %vm5185_vm6, %v2787_v28  ;;  %vm5192_vm14 = vmmov %vm5187_vm9  ;;  %v2778_v49 = vsel %vm1268_vm7, %v2763_v30, 1.0 }
0x145f   :  { %4104 = vmatprep.subr.msk.mxu1 %vm5186_vm8, %v2786_v36  ;;  %v2783_v38 = vsel %vm5192_vm14, %v4095_v53, 1.0  ;;  %vm5193_vm6 = vmmov %vm5181_vm1 }
0x1460   :  { %vm5194_vm8 = vmmov %vm5181_vm1 }
0x1461   :  { %vm5199_vm14 = vmmov %vm5187_vm9 }
0x1462   :  { %4105 = vmatpush3.xpose.msk.msra.mxu1 %vm5181_vm1, %v2786_v36  ;;  %v2780_v42 = vsel %vm5199_vm14, %v2733_v16, 1.0  ;;  %vm5203_vm9 = vmmov %vm5181_vm1 }
0x1463   :  { %4106 = vmatprep.subr.msk.mxu1 %vm5188_vm3, %v2785_v25  ;;  %vm5195_vm3 = vmmov %vm5181_vm1 }
0x1466   :  { %4107 = vmatpush3.xpose.msk.msra.mxu1 %vm5190_vm2, %v2785_v25  ;;  %vm5197_vm2 = vmmov %vm5181_vm1 }
0x1467   :  { %4108 = vmatprep.subr.msk.mxu1 %vm5191_vm4, %v2784_v37  ;;  %vm5198_vm4 = vmmov %vm5181_vm1 }
0x146a   :  { %4109 = vmatpush3.xpose.msk.msra.mxu1 %vm5193_vm6, %v2784_v37  ;;  %vm5200_vm6 = vmmov %vm5181_vm1 }
0x146b   :  { %4110 = vmatprep.subr.msk.mxu1 %vm5194_vm8, %v2783_v38  ;;  %vm5201_vm8 = vmmov %vm5181_vm1 }
0x146e   :  { %4111 = vmatpush3.xpose.msk.msra.mxu1 %vm5181_vm1, %v2783_v38 }
0x146f   :  { %4112 = vmatprep.subr.msk.mxu1 %vm5195_vm3, %v2782_v39  ;;  %vm5204_vm3 = vmmov %vm5181_vm1 }
0x1472   :  { %4113 = vmatpush3.xpose.msk.msra.mxu1 %vm5197_vm2, %v2782_v39  ;;  %vm5207_vm2 = vmmov %vm5181_vm1 }
0x1473   :  { %4114 = vmatprep.subr.msk.mxu1 %vm5198_vm4, %v2781_v33  ;;  %vm5208_vm4 = vmmov %vm5181_vm1 }
0x1476   :  { %4115 = vmatpush3.xpose.msk.msra.mxu1 %vm5200_vm6, %v2781_v33 }
0x1477   :  { %4116 = vmatprep.subr.msk.mxu1 %vm5201_vm8, %v2780_v42 }
0x147a   :  { %4117 = vmatpush3.xpose.msk.msra.mxu1 %vm5202_vm5, %v2780_v42  ;;  %vm5206_vm5 = vmmov %vm5181_vm1 }
0x147d   :  { %4119 = vmatmul.mubr.msk.f32.vlgmr.msra.gmra.mxu1 %vm5203_vm9, %v2773_v43 }
0x147e   :  { %4121 = vmatprep.mubr.msk.f32.mxu1 %vm5181_vm1, %v2774_v44 }
0x1481   :  { %4122 = vmatmul.mubr.msk.f32.gmra.mxu1 %vm5204_vm3, %v2775_v45  ;;  %vm5209_vm3 = vcmp.gt.f32.partialorder %v4806_v10, 0.0 }
0x1482   :  { %4124 = vmatprep.mubr.msk.f32.mxu1 %vm5205_vm11, %v2776_v46 }
0x1485   :  { %4125 = vmatmul.mubr.msk.f32.gmra.mxu1 %vm5206_vm5, %v2777_v47  ;;  %vm5210_vm5 = vcmp.gt.f32.partialorder %v4815_v8, 0.0 }
0x1486   :  { %4127 = vmatprep.mubr.msk.f32.mxu1 %vm5207_vm2, %v2778_v49 }
0x1489   :  { %4128 = vmatmul.mubr.msk.f32.gmra.mxu1 %vm5208_vm4, %v2779_v51  ;;  %vm5211_vm4 = vcmp.gt.f32.partialorder %v4824_v5, 0.0 }
0x153d   :  { %v4120_v23 = vpop.f32.mrf.mxu1 }
0x153e   :  { %vm2942_vm14 = vcmp.gt.f32.partialorder %v4120_v23, 0.0  ;;  %v2950_v55 = vmul.f32 0.2, %v4120_v23 }
0x153f   :  { %v2902_v56 = vpop.f32.mrf.mxu1 }
0x1540   :  { %vm2941_vm6 = vcmp.gt.f32.partialorder %v2902_v56, 0.0  ;;  %v2949_v32 = vmul.f32 0.2, %v2902_v56  ;;  %v2958_v58 = vsel %vm2942_vm14, %v4120_v23, %v2950_v55  ;;  %vm5212_vm14 = vcmp.gt.f32.partialorder %v4833_v59, 0.0 }
0x1541   :  { %v4123_v62 = vpop.f32.mrf.mxu1  ;;  %v2966_v11 = vsel %vm1465_vm10, %v2958_v58, -1e+30 }
0x1542   :  { %vm2944_vm8 = vcmp.gt.f32.partialorder %v4123_v62, 0.0  ;;  %v2952_v63 = vmul.f32 0.2, %v4123_v62  ;;  %v2976_v1 = vsel %vm131_vm0, %v2966_v11, -inf  ;;  %v2957_v2 = vsel %vm2941_vm6, %v2902_v56, %v2949_v32 }
0x1543   :  { %2977 = vmax.xlane.f32.xlu0 %v2976_v1  ;;  %v2912_v60 = vpop.f32.mrf.mxu1  ;;  %v2965_v34 = vsel %vm1464_vm12, %v2957_v2, -1e+30 }
0x1544   :  { %vm2943_vm7 = vcmp.gt.f32.partialorder %v2912_v60, 0.0  ;;  %v2951_v9 = vmul.f32 0.2, %v2912_v60  ;;  %v2973_v0 = vsel %vm131_vm0, %v2965_v34, -inf  ;;  %v2960_v3 = vsel %vm2944_vm8, %v4123_v62, %v2952_v63 }
0x1545   :  { %2974 = vmax.xlane.f32.xlu1 %v2973_v0  ;;  %v4126_v40 = vpop.f32.mrf.mxu1  ;;  %v2968_v31 = vsel %vm1467_vm13, %v2960_v3, -1e+30 }
0x1546   :  { %vm2946_vm9 = vcmp.gt.f32.partialorder %v4126_v40, 0.0  ;;  %v2954_v18 = vmul.f32 0.2, %v4126_v40  ;;  %v2982_v41 = vsel %vm131_vm0, %v2968_v31, -inf  ;;  %v2959_v29 = vsel %vm2943_vm7, %v2912_v60, %v2951_v9 }
0x1547   :  { %2983 = vmax.xlane.f32.xlu0 %v2982_v41  ;;  %v2922_v35 = vpop.f32.mrf.mxu1  ;;  %v2967_v6 = vsel %vm1466_vm15, %v2959_v29, -1e+30 }
0x1548   :  { %vm2945_vm1 = vcmp.gt.f32.partialorder %v2922_v35, 0.0  ;;  %v2953_v21 = vmul.f32 0.2, %v2922_v35  ;;  %v2979_v14 = vsel %vm131_vm0, %v2967_v6, -inf  ;;  %v2962_v20 = vsel %vm2946_vm9, %v4126_v40, %v2954_v18 }
0x1549   :  { %2980 = vmax.xlane.f32.xlu1 %v2979_v14  ;;  %v4129_v19 = vpop.f32.mrf.mxu1  ;;  %v2970_v15 = vsel %vm5209_vm3, %v2962_v20, -1e+30 }
0x154a   :  { %vm2948_vm11 = vcmp.gt.f32.partialorder %v4129_v19, 0.0  ;;  %v2956_v13 = vmul.f32 0.2, %v4129_v19  ;;  %v2988_v26 = vsel %vm131_vm0, %v2970_v15, -inf  ;;  %v2961_v12 = vsel %vm2945_vm1, %v2922_v35, %v2953_v21 }
0x154b   :  { %2989 = vmax.xlane.f32.xlu0 %v2988_v26  ;;  %v2932_v7 = vpop.f32.mrf.mxu1  ;;  %v2969_v22 = vsel %vm5210_vm5, %v2961_v12, -1e+30 }
0x154c   :  { %vm2947_vm2 = vcmp.gt.f32.partialorder %v2932_v7, 0.0  ;;  %v2955_v4 = vmul.f32 0.2, %v2932_v7  ;;  %v2985_v16 = vsel %vm131_vm0, %v2969_v22, -inf  ;;  %v2964_v52 = vsel %vm2948_vm11, %v4129_v19, %v2956_v13 }
0x154d   :  { %2986 = vmax.xlane.f32.xlu1 %v2985_v16  ;;  %v2972_v53 = vsel %vm5211_vm4, %v2964_v52, -1e+30 }
0x154e   :  { %v2963_v61 = vsel %vm2947_vm2, %v2932_v7, %v2955_v4  ;;  %v2994_v17 = vsel %vm131_vm0, %v2972_v53, -inf }
0x154f   :  { %2995 = vmax.xlane.f32.xlu0 %v2994_v17  ;;  %v2971_v24 = vsel %vm5212_vm14, %v2963_v61, -1e+30 }
0x1550   :  { %v2991_v27 = vsel %vm131_vm0, %v2971_v24, -inf }
0x1551   :  { %2992 = vmax.xlane.f32.xlu1 %v2991_v27 }
0x15cc   :  { %v2978_v28 = vpop.xlane.xlu0 %2977 }
0x15cd   :  { %v2998_v30 = vsub.f32 %v2966_v11, %v2978_v28 }
0x15ce   :  { %v2975_v36 = vpop.xlane.xlu1 %2974 }
0x15cf   :  { %v3007_v25 = vmul.f32 1.442695, %v2998_v30  ;;  %v2997_v37 = vsub.f32 %v2965_v34, %v2975_v36 }
0x15d0   :  { %v2984_v38 = vpop.xlane.xlu0 %2983 }
0x15d1   :  { %4243 = vpow2.f32 %v3007_v25  ;;  %v3005_v39 = vmul.f32 1.442695, %v2997_v37  ;;  %v3000_v33 = vsub.f32 %v2968_v31, %v2984_v38 }
0x15d2   :  { %v2981_v42 = vpop.xlane.xlu1 %2980 }
0x15d3   :  { %4245 = vpow2.f32 %v3005_v39  ;;  %v3011_v43 = vmul.f32 1.442695, %v3000_v33  ;;  %v2999_v44 = vsub.f32 %v2967_v6, %v2981_v42 }
0x15d4   :  { %v2990_v45 = vpop.xlane.xlu0 %2989 }
0x15d5   :  { %4247 = vpow2.f32 %v3011_v43  ;;  %v3009_v46 = vmul.f32 1.442695, %v2999_v44  ;;  %v3002_v47 = vsub.f32 %v2970_v15, %v2990_v45 }
0x15d6   :  { %v2987_v49 = vpop.xlane.xlu1 %2986 }
0x15d7   :  { %4249 = vpow2.f32 %v3009_v46  ;;  %v3015_v51 = vmul.f32 1.442695, %v3002_v47  ;;  %v3001_v23 = vsub.f32 %v2969_v22, %v2987_v49 }
0x15d8   :  { %v2996_v55 = vpop.xlane.xlu0 %2995 }
0x15d9   :  { %4251 = vpow2.f32 %v3015_v51  ;;  %v3013_v56 = vmul.f32 1.442695, %v3001_v23  ;;  %v3004_v32 = vsub.f32 %v2972_v53, %v2996_v55 }
0x15da   :  { %v2993_v58 = vpop.xlane.xlu1 %2992 }
0x15db   :  { %4253 = vpow2.f32 %v3013_v56  ;;  %v3019_v62 = vmul.f32 1.442695, %v3004_v32  ;;  %v3003_v11 = vsub.f32 %v2971_v24, %v2993_v58 }
0x15dd   :  { %4255 = vpow2.f32 %v3019_v62  ;;  %v3017_v63 = vmul.f32 1.442695, %v3003_v11 }
0x15de   :  { %v4244_v1 = vpop.eup %4243 }
0x15df   :  { %4257 = vpow2.f32 %v3017_v63  ;;  %v3022_v2 = vsel %vm1465_vm10, %v4244_v1, 0.0  ;;  %vm5213_vm10 = vmmov %vm5209_vm3 }
0x15e0   :  { %v4246_v60 = vpop.eup %4245  ;;  %v3032_v34 = vsel %vm131_vm0, %v3022_v2, 0.0 }
0x15e1   :  { %3033 = vadd.xlane.f32.xlu0 %v3032_v34  ;;  %v3021_v9 = vsel %vm1464_vm12, %v4246_v60, 0.0  ;;  %vm5214_vm12 = vmmov %vm5210_vm5 }
0x15e2   :  { %v4248_v0 = vpop.eup %4247  ;;  %4146 = vmatprep.mubr.msk.f32.mxu0 %vm131_vm0, %v3021_v9  ;;  %v3029_v3 = vsel %vm131_vm0, %v3021_v9, 0.0 }
0x15e3   :  { %4147 = vmatmul.mubr.msk.f32.vlgmr.msra.gmra.mxu0 %vm131_vm0, %v3022_v2  ;;  %3030 = vadd.xlane.f32.xlu1 %v3029_v3  ;;  %v3024_v40 = vsel %vm1467_vm13, %v4248_v0, 0.0  ;;  %vm5215_vm13 = vmmov %vm5211_vm4 }
0x15e4   :  { %v4250_v48 = vpop.eup %4249  ;;  %v3038_v31 = vsel %vm131_vm0, %v3024_v40, 0.0 }
0x15e5   :  { %3039 = vadd.xlane.f32.xlu0 %v3038_v31  ;;  %v3023_v18 = vsel %vm1466_vm15, %v4250_v48, 0.0  ;;  %vm5216_vm15 = vmmov %vm5212_vm14 }
0x15e6   :  { %v4252_v50 = vpop.eup %4251  ;;  %4149 = vmatprep.mubr.msk.f32.mxu0 %vm131_vm0, %v3023_v18  ;;  %v3035_v41 = vsel %vm131_vm0, %v3023_v18, 0.0 }
0x15e7   :  { %4150 = vmatmul.mubr.msk.f32.gmra.mxu0 %vm131_vm0, %v3024_v40  ;;  %3036 = vadd.xlane.f32.xlu1 %v3035_v41  ;;  %v3026_v29 = vsel %vm5213_vm10, %v4252_v50, 0.0 }
0x15e8   :  { %v4254_v54 = vpop.eup %4253  ;;  %v3044_v35 = vsel %vm131_vm0, %v3026_v29, 0.0 }
0x15e9   :  { %3045 = vadd.xlane.f32.xlu0 %v3044_v35  ;;  %v3025_v6 = vsel %vm5214_vm12, %v4254_v54, 0.0 }
0x15ea   :  { %v4256_v57 = vpop.eup %4255  ;;  %4152 = vmatprep.mubr.msk.f32.mxu0 %vm131_vm0, %v3025_v6  ;;  %v3041_v21 = vsel %vm131_vm0, %v3025_v6, 0.0 }
0x15eb   :  { %4153 = vmatmul.mubr.msk.f32.gmra.mxu0 %vm131_vm0, %v3026_v29  ;;  %3042 = vadd.xlane.f32.xlu1 %v3041_v21  ;;  %v3028_v14 = vsel %vm5215_vm13, %v4256_v57, 0.0 }
0x15ec   :  { %v4258_v10 = vpop.eup %4257  ;;  %v3050_v20 = vsel %vm131_vm0, %v3028_v14, 0.0 }
0x15ed   :  { %3051 = vadd.xlane.f32.xlu0 %v3050_v20  ;;  %v3027_v19 = vsel %vm5216_vm15, %v4258_v10, 0.0 }
0x15ee   :  { %4155 = vmatprep.mubr.msk.f32.mxu0 %vm131_vm0, %v3027_v19  ;;  %v3047_v8 = vsel %vm131_vm0, %v3027_v19, 0.0 }
0x15ef   :  { %4156 = vmatmul.mubr.msk.f32.gmra.mxu0 %vm131_vm0, %v3028_v14  ;;  %3048 = vadd.xlane.f32.xlu1 %v3047_v8 }
0x166a   :  { %v3034_v15 = vpop.xlane.xlu0 %3033 }
0x166b   :  { %v3183_v12 = vadd.f32 1e-15, %v3034_v15 }
0x166c   :  { %v3031_v13 = vpop.xlane.xlu1 %3030 }
0x166d   :  { %v3182_v7 = vadd.f32 1e-15, %v3031_v13  ;;  %4259 = vrcp.f32 %v3183_v12 }
0x166e   :  { %v3040_v26 = vpop.xlane.xlu0 %3039 }
0x166f   :  { %v3185_v4 = vadd.f32 1e-15, %v3040_v26  ;;  %4261 = vrcp.f32 %v3182_v7 }
0x1670   :  { %v3037_v5 = vpop.xlane.xlu1 %3036 }
0x1671   :  { %v3184_v59 = vadd.f32 1e-15, %v3037_v5  ;;  %4263 = vrcp.f32 %v3185_v4 }
0x1672   :  { %v3046_v22 = vpop.xlane.xlu0 %3045 }
0x1673   :  { %v3187_v52 = vadd.f32 1e-15, %v3046_v22  ;;  %4265 = vrcp.f32 %v3184_v59 }
0x1674   :  { %v3043_v16 = vpop.xlane.xlu1 %3042 }
0x1675   :  { %v3186_v61 = vadd.f32 1e-15, %v3043_v16  ;;  %4267 = vrcp.f32 %v3187_v52 }
0x1676   :  { %v3052_v53 = vpop.xlane.xlu0 %3051 }
0x1677   :  { %v3189_v17 = vadd.f32 1e-15, %v3052_v53  ;;  %4269 = vrcp.f32 %v3186_v61 }
0x1678   :  { %v3049_v24 = vpop.xlane.xlu1 %3048 }
0x1679   :  { %v3188_v27 = vadd.f32 1e-15, %v3049_v24  ;;  %4271 = vrcp.f32 %v3189_v17 }
0x167a   :  { %v4260_v28 = vpop.eup %4259 }
0x167b   :  { %4273 = vrcp.f32 %v3188_v27 }
0x167c   :  { %v4262_v25 = vpop.eup %4261 }
0x167e   :  { %v4264_v33 = vpop.eup %4263 }
0x1680   :  { %v4266_v47 = vpop.eup %4265 }
0x1682   :  { %v4268_v23 = vpop.eup %4267 }
0x1684   :  { %v4270_v62 = vpop.eup %4269 }
0x1686   :  { %v4272_v60 = vpop.eup %4271 }
0x1688   :  { %v4274_v31 = vpop.eup %4273 }
0x16a3   :  { %v4148_v30 = vpop.f32.mrf.mxu0 }
0x16a4   :  { %v3193_v36 = vmul.f32 %v4260_v28, %v4148_v30 }
0x16a5   :  { %v3143_v37 = vpop.f32.mrf.mxu0 }
0x16a6   :  { %v3215_v38 = vmin.f32 %v3193_v36, 0.0  ;;  %v3191_v39 = vmul.f32 %v4262_v25, %v3143_v37  ;;  %vm3207_vm0 = vcmp.gt.f32.partialorder %v3193_v36, 0.0 }
0x16a7   :  { %v4151_v42 = vpop.f32.mrf.mxu0 }
0x16a8   :  { %v3224_v43 = vmul.f32 1.442695, %v3215_v38  ;;  %v3214_v44 = vmin.f32 %v3191_v39, 0.0  ;;  %v3197_v45 = vmul.f32 %v4264_v33, %v4151_v42  ;;  %vm3206_vm6 = vcmp.gt.f32.partialorder %v3191_v39, 0.0 }
0x16a9   :  { %v3153_v46 = vpop.f32.mrf.mxu0 }
0x16aa   :  { %4275 = vpow2.f32 %v3224_v43  ;;  %v3222_v49 = vmul.f32 1.442695, %v3214_v44  ;;  %v3217_v51 = vmin.f32 %v3197_v45, 0.0  ;;  %v3195_v55 = vmul.f32 %v4266_v47, %v3153_v46 }
0x16ab   :  { %v4154_v56 = vpop.f32.mrf.mxu0  ;;  %vm3209_vm8 = vcmp.gt.f32.partialorder %v3197_v45, 0.0 }
0x16ac   :  { %4277 = vpow2.f32 %v3222_v49  ;;  %v3228_v32 = vmul.f32 1.442695, %v3217_v51  ;;  %v3201_v58 = vmul.f32 %v4268_v23, %v4154_v56  ;;  %v3216_v11 = vmin.f32 %v3195_v55, 0.0 }
0x16ad   :  { %v3163_v63 = vpop.f32.mrf.mxu0  ;;  %vm3208_vm7 = vcmp.gt.f32.partialorder %v3195_v55, 0.0 }
0x16ae   :  { %4279 = vpow2.f32 %v3228_v32  ;;  %v3219_v1 = vmin.f32 %v3201_v58, 0.0  ;;  %v3199_v2 = vmul.f32 %v4270_v62, %v3163_v63  ;;  %v3226_v34 = vmul.f32 1.442695, %v3216_v11 }
0x16af   :  { %v4157_v9 = vpop.f32.mrf.mxu0  ;;  %vm3211_vm9 = vcmp.gt.f32.partialorder %v3201_v58, 0.0 }
0x16b0   :  { %v3232_v0 = vmul.f32 1.442695, %v3219_v1  ;;  %v3218_v3 = vmin.f32 %v3199_v2, 0.0  ;;  %v3205_v40 = vmul.f32 %v4272_v60, %v4157_v9  ;;  %4281 = vpow2.f32 %v3226_v34 }
0x16b1   :  { %v3173_v48 = vpop.f32.mrf.mxu0  ;;  %vm3210_vm1 = vcmp.gt.f32.partialorder %v3199_v2, 0.0 }
0x16b2   :  { %4283 = vpow2.f32 %v3232_v0  ;;  %v3230_v18 = vmul.f32 1.442695, %v3218_v3  ;;  %v3221_v50 = vmin.f32 %v3205_v40, 0.0  ;;  %v3203_v41 = vmul.f32 %v4274_v31, %v3173_v48 }
0x16b3   :  { %vm3213_vm3 = vcmp.gt.f32.partialorder %v3205_v40, 0.0 }
0x16b4   :  { %4285 = vpow2.f32 %v3230_v18  ;;  %v3236_v29 = vmul.f32 1.442695, %v3221_v50  ;;  %v3220_v54 = vmin.f32 %v3203_v41, 0.0  ;;  %vm3212_vm11 = vcmp.gt.f32.partialorder %v3203_v41, 0.0 }
0x16b6   :  { %4287 = vpow2.f32 %v3236_v29  ;;  %v3234_v6 = vmul.f32 1.442695, %v3220_v54 }
0x16b7   :  { %v4276_v35 = vpop.eup %4275 }
0x16b8   :  { %v3387_v57 = vadd.f32 -1.0, %v4276_v35  ;;  %4289 = vpow2.f32 %v3234_v6 }
0x16b9   :  { %v4278_v21 = vpop.eup %4277 }
0x16ba   :  { %v3247_v14 = vsel %vm3207_vm0, %v3193_v36, %v3387_v57  ;;  %v3386_v10 = vadd.f32 -1.0, %v4278_v21 }
0x16bb   :  { %v4280_v20 = vpop.eup %4279  ;;  %3255 = vst [vmem:[#allocation10 + $0x8] sm:$0xff] %v3247_v14 }
0x16bc   :  { %v3246_v19 = vsel %vm3206_vm6, %v3191_v39, %v3386_v10  ;;  %v3389_v8 = vadd.f32 -1.0, %v4280_v20 }
0x16bd   :  { %3254 = vst [vmem:[#allocation10] sm:$0xff] %v3246_v19  ;;  %v4282_v15 = vpop.eup %4281 }
0x16be   :  { %v3249_v13 = vsel %vm3209_vm8, %v3197_v45, %v3389_v8  ;;  %v3388_v12 = vadd.f32 -1.0, %v4282_v15 }
0x16bf   :  { %v4284_v26 = vpop.eup %4283  ;;  %3257 = vst [vmem:[#allocation10 + $0x18] sm:$0xff] %v3249_v13 }
0x16c0   :  { %v3391_v5 = vadd.f32 -1.0, %v4284_v26  ;;  %v3248_v22 = vsel %vm3208_vm7, %v3195_v55, %v3388_v12 }
0x16c1   :  { %v4286_v7 = vpop.eup %4285  ;;  %3256 = vst [vmem:[#allocation10 + $0x10] sm:$0xff] %v3248_v22 }
0x16c2   :  { %v3251_v4 = vsel %vm3211_vm9, %v3201_v58, %v3391_v5  ;;  %v3390_v16 = vadd.f32 -1.0, %v4286_v7 }
0x16c3   :  { %v4288_v59 = vpop.eup %4287  ;;  %3259 = vst [vmem:[#allocation10 + $0x28] sm:$0xff] %v3251_v4 }
0x16c4   :  { %v3250_v52 = vsel %vm3210_vm1, %v3199_v2, %v3390_v16  ;;  %v3393_v53 = vadd.f32 -1.0, %v4288_v59 }
0x16c5   :  { %3258 = vst [vmem:[#allocation10 + $0x20] sm:$0xff] %v3250_v52  ;;  %v4290_v61 = vpop.eup %4289 }
0x16c6   :  { %v3253_v17 = vsel %vm3213_vm3, %v3205_v40, %v3393_v53  ;;  %v3392_v24 = vadd.f32 -1.0, %v4290_v61 }
0x16c7   :  { %3261 = vst [vmem:[#allocation10 + $0x38] sm:$0xff] %v3253_v17 }
0x16c8   :  { %v3252_v27 = vsel %vm3212_vm11, %v3203_v41, %v3392_v24 }
0x16c9   :  { %3260 = vst [vmem:[#allocation10 + $0x30] sm:$0xff] %v3252_v27 }
0x16ca   :  { %4392 = shalt.err (!%p4389_p10)
}
0x16cb   :  { %3273 = dma.vmem_to_hbm [thread:$0]  %s3268_s16, 1024, %s5174_s13, [#allocation4], %s4411_s30, %s4411_s30, %s4412_s14  }
0x16cc   :  { %4407 = dma.done.wait [#allocation4], 1024  }
0x16cd   :  { %4408 = vsyncadd [#allocation4], 4294966272 }
0x16ce   :  { %3277 = vsyncpa [#allocation3], 1 }
0x16cf   :  { %3278 = vsyncpa [#allocation6], 1 }
0x16d0   :  { %3279 = vsyncpa [#allocation9], 1 }
0x16d1   :  { %3280 = vsyncpa [#allocation4], 1 }

</bundles_post_ra>
